<compile_context>
chip_gen: v5e
topology: v5e:2x2
jax: 0.10.0
libtpu: 0.0.40
codegen_flags: <defaults>
</compile_context>

<pallas_src>
import jax
import jax.numpy as jnp
from jax.experimental import pallas as pl
from jax.experimental.pallas import tpu as pltpu

INPUT_DIM = 784    # mnist['data'].shape[-1]
HIDDEN_DIM = 512   # hp.hidden_dim
OUT_DIM = 10       # hp.out_dim
N_PAD = 128        # lane-dense padded output dim


def _round_up(x, m):
    return (x + m - 1) // m * m


def mlp_kernel(x_ref, w1_ref, b1_ref, w2_ref, b2_ref, o_ref):
    # Cast x f32->bf16 in-kernel (VPU work, hidden under the MXU), then
    # h = relu(x @ W1 + b1) with f32 MXU accumulation and f32 VPU bias/relu.
    x = x_ref[...].astype(jnp.bfloat16)
    h = jnp.dot(x, w1_ref[...], preferred_element_type=jnp.float32)
    h = jnp.maximum(h + b1_ref[...], 0.0)          # (TB, H) + (1, H) broadcast
    # o = h @ W2 + b2 -- feed MXU bf16 again, keep the f32 accumulator.
    o = jnp.dot(h.astype(jnp.bfloat16), w2_ref[...],
                preferred_element_type=jnp.float32)
    o_ref[...] = (o + b2_ref[...]).astype(o_ref.dtype)


def prepare_params(w1, b1, w2, b2):
    """One-time weight prep (hoisted out of the per-call forward).

    w1: (784, 512), b1: (512,), w2: (512, 10), b2: (10,).
    Returns bf16 matmul weights (W2 zero-padded on the output dim to 128 so
    stores are unmasked full-lane vst) and f32 biases.
    """
    w1_p = w1.astype(jnp.bfloat16)                                   # (784, 512)
    b1_p = b1.reshape(1, HIDDEN_DIM).astype(jnp.float32)             # (1, 512)
    w2_p = jnp.zeros((HIDDEN_DIM, N_PAD), jnp.bfloat16)
    w2_p = w2_p.at[:, :OUT_DIM].set(w2.astype(jnp.bfloat16))         # (512, 128)
    b2_p = jnp.zeros((1, N_PAD), jnp.float32)
    b2_p = b2_p.at[0, :OUT_DIM].set(b2.astype(jnp.float32))          # (1, 128)
    return w1_p, b1_p, w2_p, b2_p


def _pick_batch_tile(batch, tile_b):
    # >= 2 grid steps whenever the batch allows it, so the "parallel" batch
    # axis can be split across both v7x TensorCores; tile is a multiple of 8
    # (f32 sublane) and capped at tile_b.
    if batch >= 16:
        n_tiles = max(2, pl.cdiv(batch, tile_b))
    else:
        n_tiles = 1
    return _round_up(pl.cdiv(batch, n_tiles), 8)


def mlp_forward(x, w1_p, b1_p, w2_p, b2_p, *, tile_b=1024):
    """x: (B, 784) f32; prepared params from prepare_params()."""
    batch = x.shape[0]
    tb = _pick_batch_tile(batch, tile_b)
    grid = (pl.cdiv(batch, tb),)   # ragged last tile is masked by Pallas

    out_p = pl.pallas_call(
        mlp_kernel,
        out_shape=jax.ShapeDtypeStruct((batch, N_PAD), jnp.float32),
        grid=grid,
        in_specs=[
            pl.BlockSpec((tb, INPUT_DIM), lambda i: (i, 0)),           # x tile (f32)
            pl.BlockSpec((INPUT_DIM, HIDDEN_DIM), lambda i: (0, 0)),   # W1 (resident)
            pl.BlockSpec((1, HIDDEN_DIM), lambda i: (0, 0)),           # b1 (resident)
            pl.BlockSpec((HIDDEN_DIM, N_PAD), lambda i: (0, 0)),       # W2 (resident)
            pl.BlockSpec((1, N_PAD), lambda i: (0, 0)),                # b2 (resident)
        ],
        out_specs=pl.BlockSpec((tb, N_PAD), lambda i: (i, 0)),
        compiler_params=pltpu.CompilerParams(
            dimension_semantics=("parallel",),
        ),
    )(x, w1_p, b1_p, w2_p, b2_p)

    # Slice the 10 real logit columns back out of the lane-dense 128 block.
    return out_p[:, :OUT_DIM]


if __name__ == "__main__":
    key = jax.random.PRNGKey(0)
    k_x, k_w1, k_b1, k_w2, k_b2 = jax.random.split(key, 5)

    batch = 100  # hp.batch_size = 100

    x = jax.random.normal(k_x, (batch, INPUT_DIM), dtype=jnp.float32)
    # Deterministic parameter init (stand-in for the custom Linear init).
    w1 = jax.random.normal(k_w1, (INPUT_DIM, HIDDEN_DIM), dtype=jnp.float32) * 0.05
    b1 = jax.random.normal(k_b1, (HIDDEN_DIM,), dtype=jnp.float32) * 0.01
    w2 = jax.random.normal(k_w2, (HIDDEN_DIM, OUT_DIM), dtype=jnp.float32) * 0.05
    b2 = jax.random.normal(k_b2, (OUT_DIM,), dtype=jnp.float32) * 0.01

    # Weight prep happens once, outside the per-call jitted forward.
    params = jax.tree_util.tree_map(jax.device_put, prepare_params(w1, b1, w2, b2))

    fwd = jax.jit(mlp_forward)
    out = jax.block_until_ready(fwd(x, *params))

    # Reference mirroring the kernel's bf16-input / f32-accumulate numerics.
    xb = x.astype(jnp.bfloat16).astype(jnp.float32)
    w1b = w1.astype(jnp.bfloat16).astype(jnp.float32)
    w2b = w2.astype(jnp.bfloat16).astype(jnp.float32)
    h_ref = jnp.maximum(xb @ w1b + b1, 0.0)
    o_ref = h_ref.astype(jnp.bfloat16).astype(jnp.float32) @ w2b + b2

    assert out.shape == (batch, OUT_DIM)
    assert jnp.allclose(out, o_ref, atol=2e-2, rtol=2e-2), (
        float(jnp.max(jnp.abs(out - o_ref))))

    print("KERNEL_OK")
</pallas_src>

<mosaic_0001>
module attributes {stable_mosaic.version = 11 : i64} {
  func.func @mlp_kernel(%arg0: i32, %arg1: memref<56x784xf32, #tpu.memory_space<vmem>>, %arg2: memref<784x512xbf16, #tpu.memory_space<vmem>>, %arg3: memref<1x512xf32, #tpu.memory_space<vmem>>, %arg4: memref<512x128xbf16, #tpu.memory_space<vmem>>, %arg5: memref<1x128xf32, #tpu.memory_space<vmem>>, %arg6: memref<56x128xf32, #tpu.memory_space<vmem>>) attributes {dimension_semantics = [#tpu.dimension_semantics<parallel>], iteration_bounds = array<i64: 2>, scalar_prefetch = 0 : i64, scratch_operands = 0 : i64, tpu.core_type = #tpu.core_type<tc>, window_params = [{transform_indices = @transform_0, window_bounds = array<i64: 56, 784>}, {pipeline_mode = #tpu.pipeline_mode<synchronous>, transform_indices = @transform_1, window_bounds = array<i64: 784, 512>}, {pipeline_mode = #tpu.pipeline_mode<synchronous>, transform_indices = @transform_2, window_bounds = array<i64: 1, 512>}, {pipeline_mode = #tpu.pipeline_mode<synchronous>, transform_indices = @transform_3, window_bounds = array<i64: 512, 128>}, {pipeline_mode = #tpu.pipeline_mode<synchronous>, transform_indices = @transform_4, window_bounds = array<i64: 1, 128>}, {transform_indices = @transform_5, window_bounds = array<i64: 56, 128>}]} {
    %c0 = arith.constant 0 : index
    %c0_0 = arith.constant 0 : index
    %0 = vector.load %arg1[%c0, %c0_0] : memref<56x784xf32, #tpu.memory_space<vmem>>, vector<56x784xf32>
    %1 = arith.truncf %0 : vector<56x784xf32> to vector<56x784xbf16>
    %c0_1 = arith.constant 0 : index
    %c0_2 = arith.constant 0 : index
    %2 = vector.load %arg2[%c0_1, %c0_2] : memref<784x512xbf16, #tpu.memory_space<vmem>>, vector<784x512xbf16>
    %cst = arith.constant dense<0.000000e+00> : vector<56x512xf32>
    %3 = tpu.matmul %1, %2, %cst {dimension_numbers = #tpu.dot_dimension_numbers<[1], [0], [0], [1], [0, 0, 1, 1], [], []>} : vector<56x784xbf16>, vector<784x512xbf16>, vector<56x512xf32> -> vector<56x512xf32>
    %c0_3 = arith.constant 0 : index
    %c0_4 = arith.constant 0 : index
    %4 = vector.load %arg3[%c0_3, %c0_4] : memref<1x512xf32, #tpu.memory_space<vmem>>, vector<1x512xf32>
    %5 = vector.broadcast %4 : vector<1x512xf32> to vector<56x512xf32>
    %6 = arith.addf %3, %5 : vector<56x512xf32>
    %cst_5 = arith.constant 0.000000e+00 : f32
    %7 = vector.broadcast %cst_5 : f32 to vector<56x512xf32>
    %8 = arith.maximumf %6, %7 : vector<56x512xf32>
    %9 = arith.truncf %8 : vector<56x512xf32> to vector<56x512xbf16>
    %c0_6 = arith.constant 0 : index
    %c0_7 = arith.constant 0 : index
    %10 = vector.load %arg4[%c0_6, %c0_7] : memref<512x128xbf16, #tpu.memory_space<vmem>>, vector<512x128xbf16>
    %cst_8 = arith.constant dense<0.000000e+00> : vector<56x128xf32>
    %11 = tpu.matmul %9, %10, %cst_8 {dimension_numbers = #tpu.dot_dimension_numbers<[1], [0], [0], [1], [0, 0, 1, 1], [], []>} : vector<56x512xbf16>, vector<512x128xbf16>, vector<56x128xf32> -> vector<56x128xf32>
    %c0_9 = arith.constant 0 : index
    %c0_10 = arith.constant 0 : index
    %12 = vector.load %arg5[%c0_9, %c0_10] : memref<1x128xf32, #tpu.memory_space<vmem>>, vector<1x128xf32>
    %13 = vector.broadcast %12 : vector<1x128xf32> to vector<56x128xf32>
    %14 = arith.addf %11, %13 : vector<56x128xf32>
    %c0_11 = arith.constant 0 : index
    %c0_12 = arith.constant 0 : index
    %15 = vector.load %arg6[%c0_11, %c0_12] : memref<56x128xf32, #tpu.memory_space<vmem>>, vector<56x128xf32>
    tpu.vector_store %arg6[%c0_11, %c0_12], %14 {strides = array<i32>} : memref<56x128xf32, #tpu.memory_space<vmem>>, vector<56x128xf32>,
    return
  }
  func.func @transform_0(%arg0: i32) -> (i32, i32) {
    %c0_i32 = arith.constant 0 : i32
    %c0_i32_0 = arith.constant 0 : i32
    return %arg0, %c0_i32 : i32, i32
  }
  func.func @transform_1(%arg0: i32) -> (i32, i32) {
    %c0_i32 = arith.constant 0 : i32
    %c0_i32_0 = arith.constant 0 : i32
    %c0_i32_1 = arith.constant 0 : i32
    return %c0_i32, %c0_i32_0 : i32, i32
  }
  func.func @transform_2(%arg0: i32) -> (i32, i32) {
    %c0_i32 = arith.constant 0 : i32
    %c0_i32_0 = arith.constant 0 : i32
    %c0_i32_1 = arith.constant 0 : i32
    return %c0_i32, %c0_i32_0 : i32, i32
  }
  func.func @transform_3(%arg0: i32) -> (i32, i32) {
    %c0_i32 = arith.constant 0 : i32
    %c0_i32_0 = arith.constant 0 : i32
    %c0_i32_1 = arith.constant 0 : i32
    return %c0_i32, %c0_i32_0 : i32, i32
  }
  func.func @transform_4(%arg0: i32) -> (i32, i32) {
    %c0_i32 = arith.constant 0 : i32
    %c0_i32_0 = arith.constant 0 : i32
    %c0_i32_1 = arith.constant 0 : i32
    return %c0_i32, %c0_i32_0 : i32, i32
  }
  func.func @transform_5(%arg0: i32) -> (i32, i32) {
    %c0_i32 = arith.constant 0 : i32
    %c0_i32_0 = arith.constant 0 : i32
    return %arg0, %c0_i32 : i32, i32
  }
}

</mosaic_0001>

<bundles_post_ra>
// kernel: mlp_forward.1
= control target key start
LH: loop header
LB: loop body
LE: loop exit
PB: predicated region body
PF: predicated region fallthrough
CT: control target
= control target key end

     0   :  { %10 = vsyncpa [#allocation3], 0  ;;  %s5401_s0 = inlined_call_operand.hbm [shape: f32[100,784], index: 0, kind: input, shape index: {}]   ;;  %s5402_s1 = inlined_call_operand.hbm [shape: bf16[784,512], index: 1, kind: input, shape index: {}]   ;;  %s5403_s2 = inlined_call_operand.hbm [shape: f32[1,512], index: 2, kind: input, shape index: {}]   ;;  %s5404_s3 = inlined_call_operand.hbm [shape: bf16[512,128], index: 3, kind: input, shape index: {}]   ;;  %s5405_s4 = inlined_call_operand.vmem [shape: f32[1,128], index: 4, kind: input, shape index: {}]   ;;  %s5406_s5 = inlined_call_operand.vmem [shape: f32[100,128], index: 5, kind: output, shape index: {}]  }
   0x1   :  { %12 = vsyncpa [#allocation3 + $0x1], 0 }
   0x2   :  { %13 = vsyncpa [#allocation5], 0 }
   0x3   :  { %14 = vsyncpa [#allocation8], 0  ;;  %s4684_s18 = smov 0   ;;  %s4686_s19 = smov 0  }
   0x4   :  { %s4688_s20 = smov 0   ;;  %s4690_s21 = smov 0  }
   0x5 LB: > { %s4703_s22 = sadd.s32 4294967295, %s4610_s21   ;;  %s4706_s23 = sadd.s32 1, %s4610_s21   ;;  %s4610_s21 = sphi %s4690_s21, %s5424_s21   ;;  %s4606_s20 = sphi %s4688_s20, %s5423_s20   ;;  %s4602_s19 = sphi %s4686_s19, %s5422_s19   ;;  %s4598_s18 = sphi %s4684_s18, %s5421_s18  }
   0x6   : > { %s24_s24 = ssub.s32 %s4610_s21, %s4706_s23  ;;  %s27_s25 = sadd.s32 1, %s4606_s20 }
   0x7   : > { %p25_p0 = scmp.eq.s32.totalorder %s24_s24, 0  ;;  %p34_p1 = scmp.ne.s32.totalorder %s4606_s20, %s4602_s19 }
   0x8   : > { %p35_p2 = scmp.eq.s32.totalorder %s4610_s21, 0  ;;  %p40_p3 = scmp.ne.s32.totalorder %s4602_s19, %s4598_s18 }
   0x9   : > { %s4716_s26 = scalar_select %p25_p0, %s4606_s20, %s27_s25  }
   0xa   : > { %p4718_p4 = por %p35_p2, %p34_p1  ;;  %p5407_p5 = scmp.eq.s32.totalorder %s4703_s22, 0 }
   0xb   : > { %p148_p6 = scmp.eq.s32.totalorder %s4703_s22, 1  ;;  %p3076_p7 = scmp.ge.s32.totalorder %s4610_s21, 1 }
   0xc   : > { %p4727_p8 = por %p5407_p5, %p40_p3  ;;  %p161_p9 = scmp.lt.s32.totalorder %s4610_s21, 3 }
   0xd   : > { %p4732_p10 = por %p148_p6, %p34_p1  ;;  %s172_s8 = sshll.u32 %s5402_s1, 4  ;;  %s173_s8 = int_to_ptr.hbm [resolvable:$true] %s172_s8 }
   0xe   : > { %p4736_p11 = pnand %p3076_p7, %p161_p9  ;;  %s4644_s9 = smov [#allocation4]  }
   0xf   : > { %s174_s10 = sshll.u32 %s4644_s9, 4  ;;  %s187_s14 = sshll.u32 %s5403_s2, 4  ;;  %s175_s10 = int_to_ptr.vmem [resolvable:$true] %s174_s10  ;;  %s188_s14 = int_to_ptr.hbm [resolvable:$true] %s187_s14 }
  0x10   : > { %p4276_p12 = pneg %p4736_p11  ;;  %s4645_s15 = smov 256  }
  0x11   : > { %s4646_s16 = smov 16   ;;  %s4647_s17 = smov [#allocation6]  }
  0x12   : > { %p4747_p13 = pnand %p4276_p12, %p5407_p5  ;;  %s189_s18 = sshll.u32 %s4647_s17, 4  ;;  %s190_s18 = int_to_ptr.vmem [resolvable:$true] %s189_s18 }
  0x13   : > { %s198_s6 = sshll.u32 %s5404_s3, 4  ;;  %s4648_s7 = smov [#allocation7]   ;;  %s199_s6 = int_to_ptr.hbm [resolvable:$true] %s198_s6 }
  0x14   : > { %4279 = dma.hbm_to_vmem [thread:$0]  (!%p4747_p13), %s173_s8, 25088, %s175_s10, [#allocation5], %s4645_s15, %s4645_s15, %s4646_s16  }
  0x15   : > { %4282 = dma.hbm_to_vmem [thread:$0]  (!%p4747_p13), %s188_s14, 64, %s190_s18, [#allocation5]  }
  0x16   : > { %s200_s9 = sshll.u32 %s4648_s7, 4  ;;  %s4649_s12 = smov 64   ;;  %s201_s9 = int_to_ptr.vmem [resolvable:$true] %s200_s9 }
  0x17   : > { %s4650_s13 = smov 4   ;;  %p3080_p0 = scmp.ge.s32.totalorder %s4610_s21, 2 }
  0x18   : > { %4285 = dma.hbm_to_vmem [thread:$0]  (!%p4747_p13), %s199_s6, 4096, %s201_s9, [#allocation8], %s4649_s12, %s4649_s12, %s4650_s13  }
  0x19   : > { %213 = sbr.rel (%p3080_p0) target bundleno = 72 (0x48), region = 32 }
  0x1e   : > { %216 = sbr.rel (!%p4718_p4) target bundleno = 72 (0x48), region = 36  ;;  %s217_s8 = sand.u32 (%p4718_p4), 1, %s4606_s20  }
  0x1f   : > { %s222_s10 = smul.u32 (%p4718_p4), 7, %s4610_s21  ;;  %s4768_s24 = scalar_lea.sflag (%p4718_p4), [#allocation3], %s217_s8 }
  0x20   : > { %s4259_s15 = smul.u32 (%p4718_p4), 392, %s217_s8 }
  0x21   : > { %s223_s16 = ssub.s32 (%p4718_p4), 13, %s222_s10 }
  0x22   : > { %p224_p1 = scmp.lt.s32.totalorder (%p4718_p4), %s223_s16, 7  ;;  %s221_s11 = scalar_lea.vmem (%p4718_p4), [#allocation2], %s4259_s15 }
  0x24   : > { %s5426_s16 = smov (!%p224_p1, %s223_s16), 7 }
  0x25   : > { %s3082_s14 = smul.u32 56, %s5426_s16 }
  0x27   : > { %s228_s17 = ssub.s32 392, %s3082_s14 }
  0x28   : > { %s229_s18 = sshll.u32 %s228_s17, 4 }
  0x29   : > { %230 = vsyncadd %s4768_s24, %s229_s18  ;;  %p4771_p2 = scmp.ne.s32.totalorder %s3082_s14, 0  ;;  %s4289_s25 = smul.u32 392, %s4610_s21 }
  0x2a   : > { %s4776_s6 = sshll.u32 %s221_s11, 4  ;;  %s4778_s7 = smul.u32 896, %s5426_s16  ;;  %s239_s6 = int_to_ptr.vmem [resolvable:$true] %s4776_s6 }
  0x2b   : > { %s234_s13 = scalar_lea.hbm %s5401_s0, %s4289_s25  ;;  %s4508_s11 = scalar_lea.hbm %s5401_s0, 728 }
  0x2c   : > { %s236_s8 = sshll.u32 %s234_s13, 4  ;;  %s4499_s21 = sshrl.u32 %s4778_s7, 4  ;;  %s4784_s8 = int_to_ptr.hbm [resolvable:$true] %s236_s8 }
  0x2d   : > { %s4497_s10 = sshra.s32 %s4784_s8, 4  ;;  %s4535_s15 = sshll.u32 %s4499_s21, 4  ;;  %s4498_s10 = int_to_ptr.hbm [resolvable:$true] %s4497_s10 }
  0x2e   : > { %p4501_p3 = scmp.ne.s32.totalorder %s4535_s15, %s4778_s7  ;;  %s4502_s14 = sadd.s32 1, %s4499_s21 }
  0x2f   : > { %p4509_p9 = scmp.lt.s32.totalorder %s4498_s10, %s5401_s0 }
  0x30   : > { %s5428_s14 = smov (!%p4501_p3, %s4502_s14), %s4499_s21 }
  0x31   : > { %s4504_s16 = scalar_lea.hbm %s4498_s10, %s5428_s14 }
  0x32   : > { %p4505_p4 = scmp.ne.s32.totalorder %s4498_s10, %s4504_s16  ;;  %p4510_p12 = scmp.lt.s32.totalorder %s4508_s11, %s4504_s16 }
  0x34   : > { %p4506_p6 = pnand %p4505_p4, %p4771_p2  ;;  %p4511_p13 = por %p4510_p12, %p4509_p9 }
  0x36   : > { %p4507_p7 = pneg %p4506_p6 }
  0x38   : > { %p4512_p0 = pnand %p4511_p13, %p4507_p7 }
  0x3a   : > { %4515 = shalt.err (!%p4512_p0)
}
  0x3b   : > { %s4516_s12 = sshra.s32 %s239_s6, 4  ;;  %s4651_s21 = smov [#allocation2]   ;;  %s4517_s12 = int_to_ptr.vmem [resolvable:$true] %s4516_s12 }
  0x3c   : > { %s4523_s13 = scalar_lea.vmem %s4517_s12, %s5428_s14  ;;  %s4527_s15 = scalar_lea.vmem %s4651_s21, 784 }
  0x3d   : > { %p4524_p1 = scmp.ne.s32.totalorder %s4517_s12, %s4523_s13  ;;  %p4529_p6 = scmp.lt.s32.totalorder %s4527_s15, %s4523_s13 }
  0x3f   : > { %p4525_p3 = pnand %p4524_p1, %p4771_p2 }
  0x41   : > { %p4526_p4 = pneg %p4525_p3 }
  0x43   : > { %p4531_p5 = pnand %p4529_p6, %p4526_p4 }
  0x45   : > { %4534 = shalt.err (!%p4531_p5)
}
  0x46   : > { %s4652_s10 = smov 896   ;;  %s4653_s16 = smov 56  }
  0x47   : > { %244 = dma.hbm_to_vmem [thread:$0]  (%p4771_p2), %s4784_s8, %s4778_s7, %s239_s6, %s4768_s24, %s4652_s10, %s4652_s10, %s4653_s16  }
  0x48 PF: > { %250 = sbr.rel (%p4736_p11) target bundleno = 896 (0x380), region = 40  ;;  %s4811_s14 = sand.u32 (!%p4736_p11), 1, %s4602_s19  }
  0x49   : > { %s4261_s17 = smul.u32 (!%p4736_p11), 392, %s4811_s14  ;;  %s253_s18 = scalar_lea.sflag (!%p4736_p11), [#allocation3], %s4811_s14 }
  0x4b   : > { %s4815_s11 = scalar_lea.vmem (!%p4736_p11), [#allocation2], %s4261_s17 }
  0x4d   : > { %4585 = dma.done.wait (%p4727_p8), %s253_s18, 6272  }
  0x4e   : > { %4587 = vsyncadd (%p4727_p8), %s253_s18, 4294961024  ;;  %p5414_p5 = scmp.eq.s32.totalorder %s4703_s22, 0 }
  0x50   : > { %4589 = dma.done.wait (%p5414_p5), [#allocation5], 25152   ;;  %p5415_p11 = pmov %p5414_p5 }
  0x51   : > { %p5416_p2 = pmov %p5414_p5 }
  0x52   : > { %4591 = vsyncadd (%p5415_p11), [#allocation5], 4294942144 }
  0x53   : > { %4593 = dma.done.wait (%p5416_p2), [#allocation8], 4096   ;;  %p5417_p7 = pmov %p5416_p2 }
  0x54   : > { %v3204_v0 = vld [vmem:[#allocation4 + $0xe0] sm:$0xf]  ;;  %v4060_v1 = vld [vmem:[#allocation4 + $0xec] sm:$0xf0]  ;;  %vm1573_vm0 = vcmask 130048   ;;  %s4262_s24 = smul.u32 56, %s4811_s14 }
  0x55   : > { %4595 = vsyncadd (%p5417_p7), [#allocation8], 4294963200  ;;  %v3332_v2 = vld [vmem:[#allocation4 + $0x1e0] sm:$0xf]  ;;  %v3205_v3 = vor.u32 %v4060_v1, %v3204_v0  ;;  %v4092_v4 = vld [vmem:[#allocation4 + $0x1ec] sm:$0xf0] }
  0x56   : > { %v3460_v5 = vld [vmem:[#allocation4 + $0x2e0] sm:$0xf]  ;;  %v4124_v6 = vld [vmem:[#allocation4 + $0x2ec] sm:$0xf0]  ;;  %v3333_v7 = vor.u32 %v4092_v4, %v3332_v2  ;;  %s5329_s27 = scalar_lea.vmem [#allocation9], %s4262_s24   ;;  %s2800_s6 = smul.u32 (%p4732_p10), 7, %s4703_s22 }
  0x57   : > { %v3461_v8 = vor.u32 %v4124_v6, %v3460_v5  ;;  %v3588_v9 = vld [vmem:[#allocation4 + $0x3e0] sm:$0xf]  ;;  %v4156_v10 = vld [vmem:[#allocation4 + $0x3ec] sm:$0xf0]  ;;  %1586 = vmatpush.bf16.msra.mxu0 %v3205_v3  ;;  %s4258_s7 = smul.u32 (%p4732_p10), 56, %s4703_s22 }
  0x58   : > { %v3188_v11 = vld [vmem:[#allocation4 + $0xc0] sm:$0xf]  ;;  %v3589_v12 = vor.u32 %v4156_v10, %v3588_v9  ;;  %v4056_v13 = vld [vmem:[#allocation4 + $0xcc] sm:$0xf0]  ;;  %1614 = vmatpush.bf16.msra.mxu1 %v3333_v7  ;;  %s2801_s8 = ssub.s32 (%p4732_p10), 13, %s2800_s6 }
  0x59   : > { %v3316_v14 = vld [vmem:[#allocation4 + $0x1c0] sm:$0xf]  ;;  %v4088_v15 = vld [vmem:[#allocation4 + $0x1cc] sm:$0xf0]  ;;  %1642 = vmatpush.bf16.msra.mxu2 %v3461_v8  ;;  %v3189_v16 = vor.u32 %v4056_v13, %v3188_v11  ;;  %p2802_p8 = scmp.lt.s32.totalorder (%p4732_p10), %s2801_s8, 7  ;;  %s5345_s12 = scalar_lea.vmem (%p4732_p10), %s5406_s5, %s4258_s7  }
  0x5a   : > { %v3317_v17 = vor.u32 %v4088_v15, %v3316_v14  ;;  %v3444_v18 = vld [vmem:[#allocation4 + $0x2c0] sm:$0xf]  ;;  %v4120_v19 = vld [vmem:[#allocation4 + $0x2cc] sm:$0xf0]  ;;  %1670 = vmatpush.bf16.msra.mxu3 %v3589_v12 }
  0x5b   : > { %v3572_v20 = vld [vmem:[#allocation4 + $0x3c0] sm:$0xf]  ;;  %v3445_v21 = vor.u32 %v4120_v19, %v3444_v18  ;;  %v4152_v22 = vld [vmem:[#allocation4 + $0x3cc] sm:$0xf0]  ;;  %1587 = vmatpush.bf16.msra.mxu0 %v3189_v16 }
  0x5c   : > { %v3172_v23 = vld [vmem:[#allocation4 + $0xa0] sm:$0xf]  ;;  %v4052_v24 = vld [vmem:[#allocation4 + $0xac] sm:$0xf0]  ;;  %v3573_v25 = vor.u32 %v4152_v22, %v3572_v20  ;;  %1615 = vmatpush.bf16.msra.mxu1 %v3317_v17 }
  0x5d   : > { %v3300_v26 = vld [vmem:[#allocation4 + $0x1a0] sm:$0xf]  ;;  %v4084_v27 = vld [vmem:[#allocation4 + $0x1ac] sm:$0xf0]  ;;  %v3173_v29 = vor.u32 %v4052_v24, %v3172_v23  ;;  %1643 = vmatpush.bf16.msra.mxu2 %v3445_v21 }
  0x5e   : > { %v3428_v28 = vld [vmem:[#allocation4 + $0x2a0] sm:$0xf]  ;;  %v4116_v30 = vld [vmem:[#allocation4 + $0x2ac] sm:$0xf0]  ;;  %v3301_v33 = vor.u32 %v4084_v27, %v3300_v26  ;;  %1671 = vmatpush.bf16.msra.mxu3 %v3573_v25 }
  0x5f   : > { %v3556_v31 = vld [vmem:[#allocation4 + $0x3a0] sm:$0xf]  ;;  %v4148_v32 = vld [vmem:[#allocation4 + $0x3ac] sm:$0xf0]  ;;  %v3429_v34 = vor.u32 %v4116_v30, %v3428_v28  ;;  %1588 = vmatpush.bf16.msra.mxu0 %v3173_v29 }
  0x60   : > { %v3156_v35 = vld [vmem:[#allocation4 + $0x80] sm:$0xf]  ;;  %v4048_v36 = vld [vmem:[#allocation4 + $0x8c] sm:$0xf0]  ;;  %v3557_v38 = vor.u32 %v4148_v32, %v3556_v31  ;;  %1616 = vmatpush.bf16.msra.mxu1 %v3301_v33 }
  0x61   : > { %v3284_v37 = vld [vmem:[#allocation4 + $0x180] sm:$0xf]  ;;  %v4080_v39 = vld [vmem:[#allocation4 + $0x18c] sm:$0xf0]  ;;  %v3157_v44 = vor.u32 %v4048_v36, %v3156_v35  ;;  %1644 = vmatpush.bf16.msra.mxu2 %v3429_v34  ;;  %v4058_v35 = vld [vmem:[#allocation4 + $0xe4] sm:$0xf] }
  0x62   : > { %v3412_v40 = vld [vmem:[#allocation4 + $0x280] sm:$0xf]  ;;  %v4112_v41 = vld [vmem:[#allocation4 + $0x28c] sm:$0xf0]  ;;  %v3285_v45 = vor.u32 %v4080_v39, %v3284_v37  ;;  %1672 = vmatpush.bf16.msra.mxu3 %v3557_v38  ;;  %v3206_v36 = vld [vmem:[#allocation4 + $0xf0] sm:$0xf0] }
  0x63   : > { %v3540_v42 = vld [vmem:[#allocation4 + $0x380] sm:$0xf]  ;;  %v4144_v43 = vld [vmem:[#allocation4 + $0x38c] sm:$0xf0]  ;;  %v3413_v46 = vor.u32 %v4112_v41, %v3412_v40  ;;  %1589 = vmatpush.bf16.msra.mxu0 %v3157_v44 }
  0x64   : > { %v3140_v47 = vld [vmem:[#allocation4 + $0x60] sm:$0xf]  ;;  %v4044_v48 = vld [vmem:[#allocation4 + $0x6c] sm:$0xf0]  ;;  %v3541_v50 = vor.u32 %v4144_v43, %v3540_v42  ;;  %1617 = vmatpush.bf16.msra.mxu1 %v3285_v45 }
  0x65   : > { %v3268_v49 = vld [vmem:[#allocation4 + $0x160] sm:$0xf]  ;;  %v4076_v51 = vld [vmem:[#allocation4 + $0x16c] sm:$0xf0]  ;;  %v3141_v56 = vor.u32 %v4044_v48, %v3140_v47  ;;  %1645 = vmatpush.bf16.msra.mxu2 %v3413_v46  ;;  %v3209_v48 = vor.u32 %v4058_v35, %v3206_v36 }
  0x66   : > { %v3396_v52 = vld [vmem:[#allocation4 + $0x260] sm:$0xf]  ;;  %v4108_v53 = vld [vmem:[#allocation4 + $0x26c] sm:$0xf0]  ;;  %v3269_v57 = vor.u32 %v4076_v51, %v3268_v49  ;;  %1673 = vmatpush.bf16.msra.mxu3 %v3541_v50 }
  0x67   : > { %v3524_v54 = vld [vmem:[#allocation4 + $0x360] sm:$0xf]  ;;  %v4140_v55 = vld [vmem:[#allocation4 + $0x36c] sm:$0xf0]  ;;  %v3397_v58 = vor.u32 %v4108_v53, %v3396_v52  ;;  %1590 = vmatpush.bf16.msra.mxu0 %v3141_v56  ;;  %v4054_v53 = vld [vmem:[#allocation4 + $0xc4] sm:$0xf] }
  0x68   : > { %v3124_v59 = vld [vmem:[#allocation4 + $0x40] sm:$0xf]  ;;  %v4040_v60 = vld [vmem:[#allocation4 + $0x4c] sm:$0xf0]  ;;  %v3525_v62 = vor.u32 %v4140_v55, %v3524_v54  ;;  %1618 = vmatpush.bf16.msra.mxu1 %v3269_v57  ;;  %v3190_v54 = vld [vmem:[#allocation4 + $0xd0] sm:$0xf0] }
  0x69   : > { %v3252_v61 = vld [vmem:[#allocation4 + $0x140] sm:$0xf]  ;;  %v4072_v63 = vld [vmem:[#allocation4 + $0x14c] sm:$0xf0]  ;;  %v3125_v4 = vor.u32 %v4040_v60, %v3124_v59  ;;  %1646 = vmatpush.bf16.msra.mxu2 %v3397_v58  ;;  %v3193_v60 = vor.u32 %v4054_v53, %v3190_v54 }
  0x6a   : > { %v3380_v0 = vld [vmem:[#allocation4 + $0x240] sm:$0xf]  ;;  %v4104_v1 = vld [vmem:[#allocation4 + $0x24c] sm:$0xf0]  ;;  %v3253_v5 = vor.u32 %v4072_v63, %v3252_v61  ;;  %1674 = vmatpush.bf16.msra.mxu3 %v3525_v62  ;;  %v4050_v63 = vld [vmem:[#allocation4 + $0xa4] sm:$0xf] }
  0x6b   : > { %v3508_v2 = vld [vmem:[#allocation4 + $0x340] sm:$0xf]  ;;  %v4136_v3 = vld [vmem:[#allocation4 + $0x34c] sm:$0xf0]  ;;  %v3381_v6 = vor.u32 %v4104_v1, %v3380_v0  ;;  %1591 = vmatpush.bf16.msra.mxu0 %v3125_v4  ;;  %v3174_v0 = vld [vmem:[#allocation4 + $0xb0] sm:$0xf0] }
  0x6c   : > { %v3108_v7 = vld [vmem:[#allocation4 + $0x20] sm:$0xf]  ;;  %v4036_v8 = vld [vmem:[#allocation4 + $0x2c] sm:$0xf0]  ;;  %v3509_v10 = vor.u32 %v4136_v3, %v3508_v2  ;;  %1619 = vmatpush.bf16.msra.mxu1 %v3253_v5  ;;  %v3177_v5 = vor.u32 %v4050_v63, %v3174_v0 }
  0x6d   : > { %v3236_v9 = vld [vmem:[#allocation4 + $0x120] sm:$0xf]  ;;  %v4068_v11 = vld [vmem:[#allocation4 + $0x12c] sm:$0xf0]  ;;  %v3109_v17 = vor.u32 %v4036_v8, %v3108_v7  ;;  %1647 = vmatpush.bf16.msra.mxu2 %v3381_v6  ;;  %v4046_v8 = vld [vmem:[#allocation4 + $0x84] sm:$0xf] }
  0x6e   : > { %v3364_v12 = vld [vmem:[#allocation4 + $0x220] sm:$0xf]  ;;  %v4100_v13 = vld [vmem:[#allocation4 + $0x22c] sm:$0xf0]  ;;  %v3237_v21 = vor.u32 %v4068_v11, %v3236_v9  ;;  %1675 = vmatpush.bf16.msra.mxu3 %v3509_v10  ;;  %v3158_v9 = vld [vmem:[#allocation4 + $0x90] sm:$0xf0] }
  0x6f   : > { %v3492_v14 = vld [vmem:[#allocation4 + $0x320] sm:$0xf]  ;;  %v4132_v15 = vld [vmem:[#allocation4 + $0x32c] sm:$0xf0]  ;;  %v3365_v22 = vor.u32 %v4100_v13, %v3364_v12  ;;  %1592 = vmatpush.bf16.msra.mxu0 %v3109_v17  ;;  %v3161_v17 = vor.u32 %v4046_v8, %v3158_v9 }
  0x70   : > { %v3092_v16 = vld [vmem:[#allocation4] sm:$0xf]  ;;  %v4032_v18 = vld [vmem:[#allocation4 + $0xc] sm:$0xf0]  ;;  %v3493_v26 = vor.u32 %v4132_v15, %v3492_v14  ;;  %1620 = vmatpush.bf16.msra.mxu1 %v3237_v21  ;;  %v4042_v21 = vld [vmem:[#allocation4 + $0x64] sm:$0xf] }
  0x71   : > { %v3220_v19 = vld [vmem:[#allocation4 + $0x100] sm:$0xf]  ;;  %v4064_v20 = vld [vmem:[#allocation4 + $0x10c] sm:$0xf0]  ;;  %v3093_v33 = vor.u32 %v4032_v18, %v3092_v16  ;;  %1648 = vmatpush.bf16.msra.mxu2 %v3365_v22  ;;  %v3142_v22 = vld [vmem:[#allocation4 + $0x70] sm:$0xf0] }
  0x72   : > { %v3348_v23 = vld [vmem:[#allocation4 + $0x200] sm:$0xf]  ;;  %v4096_v24 = vld [vmem:[#allocation4 + $0x20c] sm:$0xf0]  ;;  %v3221_v37 = vor.u32 %v4064_v20, %v3220_v19  ;;  %1676 = vmatpush.bf16.msra.mxu3 %v3493_v26 }
  0x73   : > { %v3476_v25 = vld [vmem:[#allocation4 + $0x300] sm:$0xf]  ;;  %v4128_v27 = vld [vmem:[#allocation4 + $0x30c] sm:$0xf0]  ;;  %v3349_v38 = vor.u32 %v4096_v24, %v3348_v23  ;;  %1593 = vmatpush.bf16.msra.mxu0 %v3093_v33 }
  0x74   : > { %v310_v28 = vld [vmem:[%s4815_s11] sm:$0xff]  ;;  %v317_v29 = vld [vmem:[%s4815_s11 + $0x38] sm:$0xff]  ;;  %v311_v30 = vld [vmem:[%s4815_s11 + $0x8] sm:$0xff]  ;;  %v3477_v42 = vor.u32 %v4128_v27, %v3476_v25  ;;  %1621 = vmatpush.bf16.msra.mxu1 %v3221_v37 }
  0x75   : > { %v3860_v31 = vld [vmem:[#allocation4 + $0x600] sm:$0xf]  ;;  %v4224_v32 = vld [vmem:[#allocation4 + $0x60c] sm:$0xf0]  ;;  %v4837_v47 = vpack.c.bf16 %v317_v29, %v310_v28  ;;  %1649 = vmatpush.bf16.msra.mxu2 %v3349_v38  ;;  %v4038_v37 = vld [vmem:[#allocation4 + $0x44] sm:$0xf] }
  0x76   : > { %v318_v34 = vld [vmem:[%s4815_s11 + $0x40] sm:$0xff]  ;;  %v312_v39 = vld [vmem:[%s4815_s11 + $0x10] sm:$0xff]  ;;  %v319_v40 = vld [vmem:[%s4815_s11 + $0x48] sm:$0xff]  ;;  %v3861_v44 = vor.u32 %v4224_v32, %v3860_v31  ;;  %1677 = vmatpush.bf16.msra.mxu3 %v3477_v42  ;;  %v3145_v32 = vor.u32 %v4042_v21, %v3142_v22 }
  0x77   : > { %v313_v41 = vld [vmem:[%s4815_s11 + $0x18] sm:$0xff]  ;;  %v320_v43 = vld [vmem:[%s4815_s11 + $0x50] sm:$0xff]  ;;  %v4839_v51 = vpack.c.bf16 %v318_v34, %v311_v30  ;;  %v4841_v52 = vpack.c.bf16 %v319_v40, %v312_v39  ;;  %1594 = vmatmul.bf16.vlgmr.msra.gmra.mxu0 %v4837_v47  ;;  %v331_v12 = vld [vmem:[%s4815_s11 + $0xa8] sm:$0xff] }
  0x78   : > { %v3716_v45 = vld [vmem:[#allocation4 + $0x4e0] sm:$0xf]  ;;  %v4188_v46 = vld [vmem:[#allocation4 + $0x4ec] sm:$0xf0]  ;;  %v4843_v55 = vpack.c.bf16 %v320_v43, %v313_v41  ;;  %v3126_v38 = vld [vmem:[#allocation4 + $0x50] sm:$0xf0] }
  0x79   : > { %v3844_v49 = vld [vmem:[#allocation4 + $0x5e0] sm:$0xf]  ;;  %v4220_v50 = vld [vmem:[#allocation4 + $0x5ec] sm:$0xf0]  ;;  %v3717_v56 = vor.u32 %v4188_v46, %v3716_v45  ;;  %1761 = vmatpush.bf16.msrb.mxu2 %v3861_v44  ;;  %1622 = vmatmul.bf16.vlgmr.msra.gmra.mxu1 %v4839_v51  ;;  %v3129_v44 = vor.u32 %v4038_v37, %v3126_v38  ;;  %v4090_v21 = vld [vmem:[#allocation4 + $0x1e4] sm:$0xf] }
  0x7a   : > { %v3845_v57 = vor.u32 %v4220_v50, %v3844_v49  ;;  %v3700_v58 = vld [vmem:[#allocation4 + $0x4c0] sm:$0xf]  ;;  %v4184_v59 = vld [vmem:[#allocation4 + $0x4cc] sm:$0xf0]  ;;  %1782 = vmatpush.bf16.msrb.mxu3 %v3209_v48  ;;  %1650 = vmatmul.bf16.vlgmr.msra.gmra.mxu2 %v4841_v52  ;;  %v4034_v49 = vld [vmem:[#allocation4 + $0x24] sm:$0xf] }
  0x7b   : > { %v3828_v61 = vld [vmem:[#allocation4 + $0x5c0] sm:$0xf]  ;;  %v4216_v62 = vld [vmem:[#allocation4 + $0x5cc] sm:$0xf0]  ;;  %1678 = vmatmul.bf16.vlgmr.msra.gmra.mxu3 %v4843_v55  ;;  %1698 = vmatpush.bf16.msrb.mxu0 %v3717_v56  ;;  %v3701_v1 = vor.u32 %v4184_v59, %v3700_v58  ;;  %v3110_v56 = vld [vmem:[#allocation4 + $0x30] sm:$0xf0] }
  0x7c   : > { %1726 = vmatpush.bf16.msrb.mxu1 %v3845_v57  ;;  %v3829_v2 = vor.u32 %v4216_v62, %v3828_v61  ;;  %v3684_v3 = vld [vmem:[#allocation4 + $0x4a0] sm:$0xf]  ;;  %v4180_v4 = vld [vmem:[#allocation4 + $0x4ac] sm:$0xf0]  ;;  %v3113_v57 = vor.u32 %v4034_v49, %v3110_v56  ;;  %v3094_v61 = vld [vmem:[#allocation4 + $0x10] sm:$0xf0] }
  0x7d   : > { %v3812_v6 = vld [vmem:[#allocation4 + $0x5a0] sm:$0xf]  ;;  %v4212_v7 = vld [vmem:[#allocation4 + $0x5ac] sm:$0xf0]  ;;  %v3685_v10 = vor.u32 %v4180_v4, %v3684_v3  ;;  %v3318_v37 = vld [vmem:[#allocation4 + $0x1d0] sm:$0xf0] }
  0x7e   : > { %1783 = vmatpush.bf16.msrb.mxu3 %v3193_v60  ;;  %v324_v11 = vld [vmem:[%s4815_s11 + $0x70] sm:$0xff]  ;;  %v3813_v13 = vor.u32 %v4212_v7, %v3812_v6  ;;  %v4176_v15 = vld [vmem:[#allocation4 + $0x48c] sm:$0xf0]  ;;  %v327_v25 = vld [vmem:[%s4815_s11 + $0x88] sm:$0xff] }
  0x7f   : > { %1699 = vmatpush.bf16.msrb.mxu0 %v3701_v1  ;;  %v3668_v14 = vld [vmem:[#allocation4 + $0x480] sm:$0xf]  ;;  %v325_v16 = vld [vmem:[%s4815_s11 + $0x78] sm:$0xff]  ;;  %v326_v23 = vld [vmem:[%s4815_s11 + $0x80] sm:$0xff]  ;;  %v4857_v31 = vpack.c.bf16 %v331_v12, %v324_v11 }
  0x80   : > { %1727 = vmatpush.bf16.msrb.mxu1 %v3829_v2  ;;  %v3796_v18 = vld [vmem:[#allocation4 + $0x580] sm:$0xf]  ;;  %v4208_v19 = vld [vmem:[#allocation4 + $0x58c] sm:$0xf0]  ;;  %v3669_v26 = vor.u32 %v4176_v15, %v3668_v14  ;;  %v4030_v60 = vld [vmem:[#allocation4 + $0x4] sm:$0xf] }
  0x81   : > { %v332_v20 = vld [vmem:[%s4815_s11 + $0xb0] sm:$0xff]  ;;  %v333_v24 = vld [vmem:[%s4815_s11 + $0xb8] sm:$0xff]  ;;  %v334_v27 = vld [vmem:[%s4815_s11 + $0xc0] sm:$0xff]  ;;  %v3797_v28 = vor.u32 %v4208_v19, %v3796_v18  ;;  %v3097_v2 = vor.u32 %v4030_v60, %v3094_v61 }
  0x82   : > { %1784 = vmatpush.bf16.msrb.mxu3 %v3177_v5  ;;  %v3652_v29 = vld [vmem:[#allocation4 + $0x460] sm:$0xf]  ;;  %v4172_v30 = vld [vmem:[#allocation4 + $0x46c] sm:$0xf0]  ;;  %v4859_v35 = vpack.c.bf16 %v332_v20, %v325_v16  ;;  %v4861_v36 = vpack.c.bf16 %v333_v24, %v326_v23  ;;  %v4863_v39 = vpack.c.bf16 %v334_v27, %v327_v25  ;;  %v4154_v19 = vld [vmem:[#allocation4 + $0x3e4] sm:$0xf] }
  0x83   : > { %1700 = vmatpush.bf16.msrb.mxu0 %v3685_v10  ;;  %v3780_v33 = vld [vmem:[#allocation4 + $0x560] sm:$0xf]  ;;  %v4204_v34 = vld [vmem:[#allocation4 + $0x56c] sm:$0xf0]  ;;  %v3653_v40 = vor.u32 %v4172_v30, %v3652_v29  ;;  %v3590_v20 = vld [vmem:[#allocation4 + $0x3f0] sm:$0xf0] }
  0x84   : > { %1728 = vmatpush.bf16.msrb.mxu1 %v3813_v13  ;;  %v3781_v41 = vor.u32 %v4204_v34, %v3780_v33  ;;  %v3636_v42 = vld [vmem:[#allocation4 + $0x440] sm:$0xf]  ;;  %v4168_v43 = vld [vmem:[#allocation4 + $0x44c] sm:$0xf0]  ;;  %v3593_v22 = vor.u32 %v4154_v19, %v3590_v20  ;;  %v3334_v23 = vld [vmem:[#allocation4 + $0x1f0] sm:$0xf0] }
  0x85   : > { %v3764_v45 = vld [vmem:[#allocation4 + $0x540] sm:$0xf]  ;;  %v4200_v46 = vld [vmem:[#allocation4 + $0x54c] sm:$0xf0]  ;;  %v3637_v48 = vor.u32 %v4168_v43, %v3636_v42  ;;  %v4186_v24 = vld [vmem:[#allocation4 + $0x4e4] sm:$0xf] }
  0x86   : > { %1785 = vmatpush.bf16.msrb.mxu3 %v3161_v17  ;;  %v3765_v50 = vor.u32 %v4200_v46, %v3764_v45  ;;  %v3620_v53 = vld [vmem:[#allocation4 + $0x420] sm:$0xf]  ;;  %v4164_v54 = vld [vmem:[#allocation4 + $0x42c] sm:$0xf0]  ;;  %v3718_v25 = vld [vmem:[#allocation4 + $0x4f0] sm:$0xf0]  ;;  %1866 = vmatpush.bf16.msra.mxu2 %v3593_v22 }
  0x87   : > { %1701 = vmatpush.bf16.msrb.mxu0 %v3669_v26  ;;  %v3748_v58 = vld [vmem:[#allocation4 + $0x520] sm:$0xf]  ;;  %v4196_v59 = vld [vmem:[#allocation4 + $0x52c] sm:$0xf0]  ;;  %v3621_v62 = vor.u32 %v4164_v54, %v3620_v53  ;;  %v3337_v26 = vor.u32 %v4090_v21, %v3334_v23  ;;  %v3721_v27 = vor.u32 %v4186_v24, %v3718_v25  ;;  %v3462_v29 = vld [vmem:[#allocation4 + $0x2f0] sm:$0xf0] }
  0x88   : > { %1729 = vmatpush.bf16.msrb.mxu1 %v3797_v28  ;;  %1599 = vmatmul.bf16.gmra.mxu0 %v4857_v31  ;;  %v3749_v63 = vor.u32 %v4196_v59, %v3748_v58  ;;  %v3604_v0 = vld [vmem:[#allocation4 + $0x400] sm:$0xf]  ;;  %v4160_v1 = vld [vmem:[#allocation4 + $0x40c] sm:$0xf0]  ;;  %v4122_v28 = vld [vmem:[#allocation4 + $0x2e4] sm:$0xf] }
  0x89   : > { %1627 = vmatmul.bf16.gmra.mxu1 %v4859_v35  ;;  %v3732_v3 = vld [vmem:[#allocation4 + $0x500] sm:$0xf]  ;;  %v4192_v4 = vld [vmem:[#allocation4 + $0x50c] sm:$0xf0]  ;;  %v3605_v11 = vor.u32 %v4160_v1, %v3604_v0  ;;  %v4150_v30 = vld [vmem:[#allocation4 + $0x3c4] sm:$0xf] }
  0x8a   : > { %1786 = vmatpush.bf16.msrb.mxu3 %v3145_v32  ;;  %1655 = vmatmul.bf16.gmra.mxu2 %v4861_v36  ;;  %v338_v5 = vld [vmem:[%s4815_s11 + $0xe0] sm:$0xff]  ;;  %v345_v6 = vld [vmem:[%s4815_s11 + $0x118] sm:$0xff]  ;;  %v339_v7 = vld [vmem:[%s4815_s11 + $0xe8] sm:$0xff]  ;;  %v3733_v14 = vor.u32 %v4192_v4, %v3732_v3  ;;  %v3465_v32 = vor.u32 %v4122_v28, %v3462_v29 }
  0x8b   : > { %1683 = vmatmul.bf16.gmra.mxu3 %v4863_v39  ;;  %1702 = vmatpush.bf16.msrb.mxu0 %v3653_v40  ;;  %v346_v8 = vld [vmem:[%s4815_s11 + $0x120] sm:$0xff]  ;;  %v340_v9 = vld [vmem:[%s4815_s11 + $0xf0] sm:$0xff]  ;;  %v347_v10 = vld [vmem:[%s4815_s11 + $0x128] sm:$0xff]  ;;  %v4877_v15 = vpack.c.bf16 %v345_v6, %v338_v5 }
  0x8c   : > { %1730 = vmatpush.bf16.msrb.mxu1 %v3781_v41  ;;  %v341_v12 = vld [vmem:[%s4815_s11 + $0xf8] sm:$0xff]  ;;  %v348_v13 = vld [vmem:[%s4815_s11 + $0x130] sm:$0xff]  ;;  %v4879_v16 = vpack.c.bf16 %v346_v8, %v339_v7  ;;  %v4881_v17 = vpack.c.bf16 %v347_v10, %v340_v9  ;;  %v355_v53 = vld [vmem:[%s4815_s11 + $0x168] sm:$0xff] }
  0x8d   : > { %v4883_v18 = vpack.c.bf16 %v348_v13, %v341_v12  ;;  %v3574_v33 = vld [vmem:[#allocation4 + $0x3d0] sm:$0xf0]  ;;  %v4086_v34 = vld [vmem:[#allocation4 + $0x1c4] sm:$0xf]  ;;  %v4899_v58 = vpack.c.bf16 %v355_v53, %v355_v53 }
  0x8e   : > { %1787 = vmatpush.bf16.msrb.mxu3 %v3129_v44  ;;  %v3577_v38 = vor.u32 %v4150_v30, %v3574_v33  ;;  %v3321_v40 = vor.u32 %v4086_v34, %v3318_v37  ;;  %v4182_v41 = vld [vmem:[#allocation4 + $0x4c4] sm:$0xf]  ;;  %v3702_v42 = vld [vmem:[#allocation4 + $0x4d0] sm:$0xf0] }
  0x8f   : > { %1703 = vmatpush.bf16.msrb.mxu0 %v3637_v48  ;;  %v4118_v43 = vld [vmem:[#allocation4 + $0x2c4] sm:$0xf]  ;;  %v3705_v44 = vor.u32 %v4182_v41, %v3702_v42  ;;  %v3446_v45 = vld [vmem:[#allocation4 + $0x2d0] sm:$0xf0] }
  0x90   : > { %1731 = vmatpush.bf16.msrb.mxu1 %v3765_v50  ;;  %v3449_v46 = vor.u32 %v4118_v43, %v3446_v45  ;;  %v352_v48 = vld [vmem:[%s4815_s11 + $0x150] sm:$0xff]  ;;  %1867 = vmatpush.bf16.msra.mxu2 %v3577_v38  ;;  %v353_v49 = vld [vmem:[%s4815_s11 + $0x158] sm:$0xff]  ;;  %v354_v50 = vld [vmem:[%s4815_s11 + $0x160] sm:$0xff] }
  0x91   : > { %v4893_v54 = vpack.c.bf16 %v352_v48, %v352_v48  ;;  %v4895_v56 = vpack.c.bf16 %v353_v49, %v353_v49  ;;  %v4146_v59 = vld [vmem:[#allocation4 + $0x3a4] sm:$0xf]  ;;  %v3558_v60 = vld [vmem:[#allocation4 + $0x3b0] sm:$0xf0] }
  0x92   : > { %1788 = vmatpush.bf16.msrb.mxu3 %v3113_v57  ;;  %v4897_v57 = vpack.c.bf16 %v354_v50, %v354_v50  ;;  %v4082_v61 = vld [vmem:[#allocation4 + $0x1a4] sm:$0xf]  ;;  %v3686_v1 = vld [vmem:[#allocation4 + $0x4b0] sm:$0xf0] }
  0x93   : > { %1704 = vmatpush.bf16.msrb.mxu0 %v3621_v62  ;;  %v3561_v62 = vor.u32 %v4146_v59, %v3558_v60  ;;  %v4178_v0 = vld [vmem:[#allocation4 + $0x4a4] sm:$0xf]  ;;  %v3430_v5 = vld [vmem:[#allocation4 + $0x2b0] sm:$0xf0] }
  0x94   : > { %1732 = vmatpush.bf16.msrb.mxu1 %v3749_v63  ;;  %v3302_v63 = vld [vmem:[#allocation4 + $0x1b0] sm:$0xf0]  ;;  %v3689_v3 = vor.u32 %v4178_v0, %v3686_v1  ;;  %v4114_v4 = vld [vmem:[#allocation4 + $0x2a4] sm:$0xf] }
  0x95   : > { %v4142_v6 = vld [vmem:[#allocation4 + $0x384] sm:$0xf]  ;;  %1868 = vmatpush.bf16.msra.mxu2 %v3561_v62  ;;  %v3433_v7 = vor.u32 %v4114_v4, %v3430_v5  ;;  %v3542_v8 = vld [vmem:[#allocation4 + $0x390] sm:$0xf0] }
  0x96   : > { %1789 = vmatpush.bf16.msrb.mxu3 %v3097_v2  ;;  %v3305_v2 = vor.u32 %v4082_v61, %v3302_v63  ;;  %v4078_v9 = vld [vmem:[#allocation4 + $0x184] sm:$0xf]  ;;  %v3286_v10 = vld [vmem:[#allocation4 + $0x190] sm:$0xf0] }
  0x97   : > { %1705 = vmatpush.bf16.msrb.mxu0 %v3605_v11  ;;  %v3545_v11 = vor.u32 %v4142_v6, %v3542_v8  ;;  %v3289_v12 = vor.u32 %v4078_v9, %v3286_v10  ;;  %v4174_v13 = vld [vmem:[#allocation4 + $0x484] sm:$0xf]  ;;  %v3414_v21 = vld [vmem:[#allocation4 + $0x290] sm:$0xf0] }
  0x98   : > { %1733 = vmatpush.bf16.msrb.mxu1 %v3733_v14  ;;  %1604 = vmatmul.bf16.gmra.mxu0 %v4877_v15  ;;  %v3670_v14 = vld [vmem:[#allocation4 + $0x490] sm:$0xf0]  ;;  %v4110_v19 = vld [vmem:[#allocation4 + $0x284] sm:$0xf] }
  0x99   : > { %1632 = vmatmul.bf16.gmra.mxu1 %v4879_v16  ;;  %v3673_v20 = vor.u32 %v4174_v13, %v3670_v14  ;;  %v3417_v22 = vor.u32 %v4110_v19, %v3414_v21  ;;  %v314_v23 = vld [vmem:[%s4815_s11 + $0x20] sm:$0xff]  ;;  %v321_v24 = vld [vmem:[%s4815_s11 + $0x58] sm:$0xff]  ;;  %v315_v25 = vld [vmem:[%s4815_s11 + $0x28] sm:$0xff]  ;;  %1869 = vmatpush.bf16.msra.mxu2 %v3545_v11 }
  0x9a   : > { %1660 = vmatmul.bf16.gmra.mxu2 %v4881_v17  ;;  %1894 = vmatpush.bf16.msra.mxu3 %v3721_v27  ;;  %v316_v27 = vld [vmem:[%s4815_s11 + $0x30] sm:$0xff]  ;;  %v323_v28 = vld [vmem:[%s4815_s11 + $0x68] sm:$0xff]  ;;  %v4911_v29 = vpack.c.bf16 %v321_v24, %v314_v23  ;;  %v3526_v34 = vld [vmem:[#allocation4 + $0x370] sm:$0xf0] }
  0x9b   : > { %1688 = vmatmul.bf16.gmra.mxu3 %v4883_v18  ;;  %1810 = vmatpush.bf16.msra.mxu0 %v3337_v26  ;;  %v322_v26 = vld [vmem:[%s4815_s11 + $0x60] sm:$0xff]  ;;  %v4138_v33 = vld [vmem:[#allocation4 + $0x364] sm:$0xf]  ;;  %v329_v6 = vld [vmem:[%s4815_s11 + $0x98] sm:$0xff] }
  0x9c   : > { %1838 = vmatpush.bf16.msra.mxu1 %v3465_v32  ;;  %v4913_v30 = vpack.c.bf16 %v322_v26, %v315_v25  ;;  %v4915_v32 = vpack.c.bf16 %v323_v28, %v316_v27  ;;  %v4074_v37 = vld [vmem:[#allocation4 + $0x164] sm:$0xf]  ;;  %v3529_v38 = vor.u32 %v4138_v33, %v3526_v34  ;;  %v3654_v42 = vld [vmem:[#allocation4 + $0x470] sm:$0xf0] }
  0x9d   : > { %v4170_v41 = vld [vmem:[#allocation4 + $0x464] sm:$0xf]  ;;  %v3510_v50 = vld [vmem:[#allocation4 + $0x350] sm:$0xf0] }
  0x9e   : > { %1895 = vmatpush.bf16.msra.mxu3 %v3705_v44  ;;  %v3657_v44 = vor.u32 %v4170_v41, %v3654_v42  ;;  %v4106_v45 = vld [vmem:[#allocation4 + $0x264] sm:$0xf]  ;;  %1870 = vmatpush.bf16.msra.mxu2 %v3529_v38  ;;  %v3254_v59 = vld [vmem:[#allocation4 + $0x150] sm:$0xf0] }
  0x9f   : > { %1811 = vmatpush.bf16.msra.mxu0 %v3321_v40  ;;  %v3270_v40 = vld [vmem:[#allocation4 + $0x170] sm:$0xf0]  ;;  %v4134_v48 = vld [vmem:[#allocation4 + $0x344] sm:$0xf] }
  0xa0   : > { %1839 = vmatpush.bf16.msra.mxu1 %v3449_v46  ;;  %v3273_v43 = vor.u32 %v4074_v37, %v3270_v40  ;;  %v3398_v46 = vld [vmem:[#allocation4 + $0x270] sm:$0xf0]  ;;  %v4070_v53 = vld [vmem:[#allocation4 + $0x144] sm:$0xf]  ;;  %v3513_v60 = vor.u32 %v4134_v48, %v3510_v50 }
  0xa1   : > { %v3401_v49 = vor.u32 %v4106_v45, %v3398_v46  ;;  %v3257_v61 = vor.u32 %v4070_v53, %v3254_v59  ;;  %v4166_v62 = vld [vmem:[#allocation4 + $0x444] sm:$0xf]  ;;  %v3638_v63 = vld [vmem:[#allocation4 + $0x450] sm:$0xf0] }
  0xa2   : > { %1896 = vmatpush.bf16.msra.mxu3 %v3689_v3  ;;  %v4102_v0 = vld [vmem:[#allocation4 + $0x244] sm:$0xf]  ;;  %v3641_v1 = vor.u32 %v4166_v62, %v3638_v63  ;;  %1871 = vmatpush.bf16.msra.mxu2 %v3513_v60  ;;  %v330_v8 = vld [vmem:[%s4815_s11 + $0xa0] sm:$0xff]  ;;  %v337_v9 = vld [vmem:[%s4815_s11 + $0xd8] sm:$0xff] }
  0xa3   : > { %1812 = vmatpush.bf16.msra.mxu0 %v3305_v2  ;;  %v3382_v2 = vld [vmem:[#allocation4 + $0x250] sm:$0xf0]  ;;  %v328_v4 = vld [vmem:[%s4815_s11 + $0x90] sm:$0xff]  ;;  %v335_v5 = vld [vmem:[%s4815_s11 + $0xc8] sm:$0xff] }
  0xa4   : > { %1840 = vmatpush.bf16.msra.mxu1 %v3433_v7  ;;  %v3385_v3 = vor.u32 %v4102_v0, %v3382_v2  ;;  %v336_v7 = vld [vmem:[%s4815_s11 + $0xd0] sm:$0xff]  ;;  %v4928_v10 = vpack.c.bf16 %v335_v5, %v328_v4  ;;  %v3494_v14 = vld [vmem:[#allocation4 + $0x330] sm:$0xf0]  ;;  %v343_v53 = vld [vmem:[%s4815_s11 + $0x108] sm:$0xff] }
  0xa5   : > { %v4930_v11 = vpack.c.bf16 %v336_v7, %v329_v6  ;;  %v4130_v13 = vld [vmem:[#allocation4 + $0x324] sm:$0xf]  ;;  %v3238_v21 = vld [vmem:[#allocation4 + $0x130] sm:$0xf0]  ;;  %v4061_v2 = vld [vmem:[#allocation4 + $0xf4] sm:$0xf0] }
  0xa6   : > { %1897 = vmatpush.bf16.msra.mxu3 %v3673_v20  ;;  %v4066_v19 = vld [vmem:[#allocation4 + $0x124] sm:$0xf]  ;;  %v3497_v20 = vor.u32 %v4130_v13, %v3494_v14  ;;  %v3622_v23 = vld [vmem:[#allocation4 + $0x430] sm:$0xf0]  ;;  %v3340_v6 = vld [vmem:[#allocation4 + $0x1e8] sm:$0xf] }
  0xa7   : > { %1813 = vmatpush.bf16.msra.mxu0 %v3289_v12  ;;  %v4932_v12 = vpack.c.bf16 %v337_v9, %v330_v8  ;;  %v3241_v24 = vor.u32 %v4066_v19, %v3238_v21  ;;  %v4098_v26 = vld [vmem:[#allocation4 + $0x224] sm:$0xf]  ;;  %v3366_v27 = vld [vmem:[#allocation4 + $0x230] sm:$0xf0]  ;;  %v4093_v7 = vld [vmem:[#allocation4 + $0x1f4] sm:$0xf0] }
  0xa8   : > { %1609 = vmatmul.bf16.gmra.mxu0 %v4893_v54  ;;  %1841 = vmatpush.bf16.msra.mxu1 %v3417_v22  ;;  %v4162_v22 = vld [vmem:[#allocation4 + $0x424] sm:$0xf]  ;;  %v3369_v33 = vor.u32 %v4098_v26, %v3366_v27  ;;  %v3478_v34 = vld [vmem:[#allocation4 + $0x310] sm:$0xf0]  ;;  %v3341_v9 = vor.u32 %v4093_v7, %v3340_v6  ;;  %v3196_v21 = vld [vmem:[#allocation4 + $0xc8] sm:$0xf] }
  0xa9   : > { %1637 = vmatmul.bf16.gmra.mxu1 %v4895_v56  ;;  %v3625_v25 = vor.u32 %v4162_v22, %v3622_v23  ;;  %v4126_v28 = vld [vmem:[#allocation4 + $0x304] sm:$0xf]  ;;  %1872 = vmatpush.bf16.msra.mxu2 %v3497_v20  ;;  %v3222_v38 = vld [vmem:[#allocation4 + $0x110] sm:$0xf0]  ;;  %v4057_v22 = vld [vmem:[#allocation4 + $0xd4] sm:$0xf0] }
  0xaa   : > { %1665 = vmatmul.bf16.gmra.mxu2 %v4897_v57  ;;  %1898 = vmatpush.bf16.msra.mxu3 %v3657_v44  ;;  %v4062_v37 = vld [vmem:[#allocation4 + $0x104] sm:$0xf]  ;;  %v3481_v40 = vor.u32 %v4126_v28, %v3478_v34  ;;  %v3350_v46 = vld [vmem:[#allocation4 + $0x210] sm:$0xf0]  ;;  %v3324_v26 = vld [vmem:[#allocation4 + $0x1c8] sm:$0xf] }
  0xab   : > { %1693 = vmatmul.bf16.gmra.mxu3 %v4899_v58  ;;  %1814 = vmatpush.bf16.msra.mxu0 %v3273_v43  ;;  %v3225_v41 = vor.u32 %v4062_v37, %v3222_v38  ;;  %v4158_v42 = vld [vmem:[#allocation4 + $0x404] sm:$0xf]  ;;  %v3606_v43 = vld [vmem:[#allocation4 + $0x410] sm:$0xf0]  ;;  %v4089_v27 = vld [vmem:[#allocation4 + $0x1d4] sm:$0xf0] }
  0xac   : > { %1842 = vmatpush.bf16.msra.mxu1 %v3401_v49  ;;  %v4094_v44 = vld [vmem:[#allocation4 + $0x204] sm:$0xf]  ;;  %v3609_v45 = vor.u32 %v4158_v42, %v3606_v43  ;;  %v342_v49 = vld [vmem:[%s4815_s11 + $0x100] sm:$0xff]  ;;  %v349_v50 = vld [vmem:[%s4815_s11 + $0x138] sm:$0xff]  ;;  %v3325_v37 = vor.u32 %v4089_v27, %v3324_v26 }
  0xad   : > { %v3353_v48 = vor.u32 %v4094_v44, %v3350_v46  ;;  %1873 = vmatpush.bf16.msra.mxu2 %v3481_v40  ;;  %v350_v59 = vld [vmem:[%s4815_s11 + $0x140] sm:$0xff]  ;;  %v344_v60 = vld [vmem:[%s4815_s11 + $0x110] sm:$0xff]  ;;  %v4945_v62 = vpack.c.bf16 %v349_v50, %v342_v49  ;;  %v357_v28 = vld [vmem:[%s4815_s11 + $0x178] sm:$0xff] }
  0xae   : > { %1899 = vmatpush.bf16.msra.mxu3 %v3641_v1  ;;  %v4947_v63 = vpack.c.bf16 %v350_v59, %v343_v53  ;;  %v3212_v1 = vld [vmem:[#allocation4 + $0xe8] sm:$0xf]  ;;  %v3846_v5 = vld [vmem:[#allocation4 + $0x5f0] sm:$0xf0]  ;;  %v4222_v14 = vld [vmem:[#allocation4 + $0x604] sm:$0xf]  ;;  %v4961_v40 = vpack.c.bf16 %v357_v28, %v357_v28 }
  0xaf   : > { %1815 = vmatpush.bf16.msra.mxu0 %v3257_v61  ;;  %v351_v61 = vld [vmem:[%s4815_s11 + $0x148] sm:$0xff]  ;;  %v3213_v4 = vor.u32 %v4061_v2, %v3212_v1  ;;  %v356_v13 = vld [vmem:[%s4815_s11 + $0x170] sm:$0xff]  ;;  %v3862_v19 = vld [vmem:[#allocation4 + $0x610] sm:$0xf0] }
  0xb0   : > { %1843 = vmatpush.bf16.msra.mxu1 %v3385_v3  ;;  %v4949_v0 = vpack.c.bf16 %v351_v61, %v344_v60  ;;  %v4218_v3 = vld [vmem:[#allocation4 + $0x5e4] sm:$0xf]  ;;  %v3865_v20 = vor.u32 %v4222_v14, %v3862_v19  ;;  %v4959_v38 = vpack.c.bf16 %v356_v13, %v356_v13  ;;  %v3180_v42 = vld [vmem:[#allocation4 + $0xa8] sm:$0xf]  ;;  %v4053_v43 = vld [vmem:[#allocation4 + $0xb4] sm:$0xf0] }
  0xb1   : > { %v3849_v8 = vor.u32 %v4218_v3, %v3846_v5  ;;  %v4214_v23 = vld [vmem:[#allocation4 + $0x5c4] sm:$0xf]  ;;  %v3814_v46 = vld [vmem:[#allocation4 + $0x5b0] sm:$0xf0]  ;;  %v4085_v49 = vld [vmem:[#allocation4 + $0x1b4] sm:$0xf0] }
  0xb2   : > { %1900 = vmatpush.bf16.msra.mxu3 %v3625_v25  ;;  %v3830_v25 = vld [vmem:[#allocation4 + $0x5d0] sm:$0xf0]  ;;  %v4210_v44 = vld [vmem:[#allocation4 + $0x5a4] sm:$0xf]  ;;  %v4970_v59 = vld [vmem:[#allocation6] sm:$0xf] }
  0xb3   : > { %1816 = vmatpush.bf16.msra.mxu0 %v3241_v24  ;;  %v3197_v24 = vor.u32 %v4057_v22, %v3196_v21  ;;  %v3833_v34 = vor.u32 %v4214_v23, %v3830_v25  ;;  %v3817_v50 = vor.u32 %v4210_v44, %v3814_v46  ;;  %v3164_v60 = vld [vmem:[#allocation4 + $0x88] sm:$0xf]  ;;  %v4049_v61 = vld [vmem:[#allocation4 + $0x94] sm:$0xf0]  ;;  %v4206_v1 = vld [vmem:[#allocation4 + $0x584] sm:$0xf] }
  0xb4   : > { %1844 = vmatpush.bf16.msra.mxu1 %v3369_v33  ;;  %v358_v33 = vld [vmem:[%s4815_s11 + $0x180] sm:$0xff]  ;;  %v3165_v2 = vor.u32 %v4049_v61, %v3164_v60  ;;  %v4973_v6 = vperm.slane %v4970_v59, 0  ;;  %v4202_v22 = vld [vmem:[#allocation4 + $0x564] sm:$0xf]  ;;  %v3276_v25 = vld [vmem:[#allocation4 + $0x168] sm:$0xf] }
  0xb5   : > { %v3798_v3 = vld [vmem:[#allocation4 + $0x590] sm:$0xf0]  ;;  %v4081_v5 = vld [vmem:[#allocation4 + $0x194] sm:$0xf0]  ;;  %v3260_v61 = vld [vmem:[#allocation4 + $0x148] sm:$0xf] }
  0xb6   : > { %1901 = vmatpush.bf16.msra.mxu3 %v3609_v45  ;;  %v3181_v45 = vor.u32 %v4053_v43, %v3180_v42  ;;  %v3801_v7 = vor.u32 %v4206_v1, %v3798_v3  ;;  %v4045_v21 = vld [vmem:[#allocation4 + $0x74] sm:$0xf0]  ;;  %v3766_v60 = vld [vmem:[#allocation4 + $0x550] sm:$0xf0] }
  0xb7   : > { %1817 = vmatpush.bf16.msra.mxu0 %v3225_v41  ;;  %v4963_v41 = vpack.c.bf16 %v358_v33, %v358_v33  ;;  %v4077_v26 = vld [vmem:[#allocation4 + $0x174] sm:$0xf0] }
  0xb8   : > { %1706 = vmatmul.bf16.vlgmr.msrb.gmra.mxu0 %v4911_v29  ;;  %1845 = vmatpush.bf16.msra.mxu1 %v3353_v48  ;;  %v3308_v48 = vld [vmem:[#allocation4 + $0x1a8] sm:$0xf]  ;;  %v3277_v33 = vor.u32 %v4077_v26, %v3276_v25  ;;  %v4073_v1 = vld [vmem:[#allocation4 + $0x154] sm:$0xf0] }
  0xb9   : > { %1734 = vmatmul.bf16.vlgmr.msrb.gmra.mxu1 %v4913_v30  ;;  %v3309_v53 = vor.u32 %v4085_v49, %v3308_v48  ;;  %v3132_v48 = vld [vmem:[#allocation4 + $0x48] sm:$0xf]  ;;  %v4041_v49 = vld [vmem:[#allocation4 + $0x54] sm:$0xf0]  ;;  %v3261_v3 = vor.u32 %v4073_v1, %v3260_v61  ;;  %v3734_v61 = vld [vmem:[#allocation4 + $0x510] sm:$0xf0] }
  0xba   : > { %3874 = vmatmul.msk.bf16.vlgmr.msrb.gmra.mxu2 %vm1573_vm0, %v4915_v32  ;;  %v3244_v25 = vld [vmem:[#allocation4 + $0x128] sm:$0xf]  ;;  %v4069_v26 = vld [vmem:[#allocation4 + $0x134] sm:$0xf0] }
  0xbb   : > { %1790 = vmatmul.bf16.vlgmr.msrb.gmra.mxu3 %v4837_v47  ;;  %1978 = vmatpush.bf16.msrb.mxu2 %v3213_v4  ;;  %v3292_v4 = vld [vmem:[#allocation4 + $0x188] sm:$0xf] }
  0xbc   : > { %1922 = vmatpush.bf16.msrb.mxu0 %v3849_v8  ;;  %2006 = vmatpush.bf16.msrb.mxu3 %v3341_v9  ;;  %v3293_v8 = vor.u32 %v4081_v5, %v3292_v4  ;;  %v3228_v1 = vld [vmem:[#allocation4 + $0x108] sm:$0xf] }
  0xbd   : > { %1957 = vmatpush.bf16.msrb.mxu1 %v3865_v20  ;;  %v3148_v20 = vld [vmem:[#allocation4 + $0x68] sm:$0xf] }
  0xbe   : > { %v3149_v23 = vor.u32 %v4045_v21, %v3148_v20  ;;  %v3116_v20 = vld [vmem:[#allocation4 + $0x28] sm:$0xf]  ;;  %v4037_v21 = vld [vmem:[#allocation4 + $0x34] sm:$0xf0] }
  0xbf   : > { %1979 = vmatpush.bf16.msrb.mxu2 %v3197_v24  ;;  %v3782_v24 = vld [vmem:[#allocation4 + $0x570] sm:$0xf0] }
  0xc0   : > { %1923 = vmatpush.bf16.msrb.mxu0 %v3833_v34  ;;  %2007 = vmatpush.bf16.msrb.mxu3 %v3325_v37  ;;  %v3785_v28 = vor.u32 %v4202_v22, %v3782_v24  ;;  %v4194_v22 = vld [vmem:[#allocation4 + $0x524] sm:$0xf]  ;;  %v3750_v24 = vld [vmem:[#allocation4 + $0x530] sm:$0xf0] }
  0xc3   : > { %1980 = vmatpush.bf16.msrb.mxu2 %v3181_v45 }
  0xc4   : > { %1924 = vmatpush.bf16.msrb.mxu0 %v3817_v50  ;;  %2008 = vmatpush.bf16.msrb.mxu3 %v3309_v53  ;;  %v4198_v50 = vld [vmem:[#allocation4 + $0x544] sm:$0xf]  ;;  %v3133_v53 = vor.u32 %v4041_v49, %v3132_v48  ;;  %v3100_v48 = vld [vmem:[#allocation4 + $0x8] sm:$0xf]  ;;  %v4033_v49 = vld [vmem:[#allocation4 + $0x14] sm:$0xf0] }
  0xc7   : > { %1981 = vmatpush.bf16.msrb.mxu2 %v3165_v2  ;;  %v3769_v2 = vor.u32 %v4198_v50, %v3766_v60  ;;  %v4190_v50 = vld [vmem:[#allocation4 + $0x504] sm:$0xf]  ;;  %v3101_v60 = vor.u32 %v4033_v49, %v3100_v48 }
  0xc8   : > { %1711 = vmatmul.bf16.gmra.mxu0 %v4928_v10  ;;  %2009 = vmatpush.bf16.msrb.mxu3 %v3293_v8 }
  0xc9   : > { %1739 = vmatmul.bf16.gmra.mxu1 %v4930_v11  ;;  %1925 = vmatpush.bf16.msrb.mxu0 %v3801_v7 }
  0xca   : > { %3875 = vmatmul.msk.bf16.gmra.mxu2 %vm1573_vm0, %v4932_v12 }
  0xcb   : > { %1795 = vmatmul.bf16.gmra.mxu3 %v4857_v31  ;;  %1982 = vmatpush.bf16.msrb.mxu2 %v3149_v23  ;;  %v3117_v23 = vor.u32 %v4037_v21, %v3116_v20 }
  0xcc   : > { %2010 = vmatpush.bf16.msrb.mxu3 %v3277_v33  ;;  %v3245_v33 = vor.u32 %v4069_v26, %v3244_v25  ;;  %v4125_v26 = vld [vmem:[#allocation4 + $0x2f4] sm:$0xf0] }
  0xcd   : > { %1926 = vmatpush.bf16.msrb.mxu0 %v3785_v28  ;;  %v3753_v28 = vor.u32 %v4194_v22, %v3750_v24  ;;  %v3724_v22 = vld [vmem:[#allocation4 + $0x4e8] sm:$0xf] }
  0xce   : > { %v3468_v24 = vld [vmem:[#allocation4 + $0x2e8] sm:$0xf] }
  0xcf   : > { %1983 = vmatpush.bf16.msrb.mxu2 %v3133_v53 }
  0xd0   : > { %2011 = vmatpush.bf16.msrb.mxu3 %v3261_v3  ;;  %v3737_v3 = vor.u32 %v4190_v50, %v3734_v61 }
  0xd1   : > { %1927 = vmatpush.bf16.msrb.mxu0 %v3769_v2  ;;  %v4065_v2 = vld [vmem:[#allocation4 + $0x114] sm:$0xf0] }
  0xd3   : > { %1984 = vmatpush.bf16.msrb.mxu2 %v3117_v23  ;;  %v4189_v23 = vld [vmem:[#allocation4 + $0x4f4] sm:$0xf0] }
  0xd4   : > { %2012 = vmatpush.bf16.msrb.mxu3 %v3245_v33  ;;  %v3725_v25 = vor.u32 %v4189_v23, %v3724_v22 }
  0xd5   : > { %1928 = vmatpush.bf16.msrb.mxu0 %v3753_v28  ;;  %v4221_v28 = vld [vmem:[#allocation4 + $0x5f4] sm:$0xf0] }
  0xd7   : > { %1985 = vmatpush.bf16.msrb.mxu2 %v3101_v60  ;;  %v4157_v60 = vld [vmem:[#allocation4 + $0x3f4] sm:$0xf0] }
  0xd8   : > { %1716 = vmatmul.bf16.gmra.mxu0 %v4945_v62 }
  0xd9   : > { %1744 = vmatmul.bf16.gmra.mxu1 %v4947_v63  ;;  %1929 = vmatpush.bf16.msrb.mxu0 %v3737_v3  ;;  %v4185_v3 = vld [vmem:[#allocation4 + $0x4d4] sm:$0xf0] }
  0xda   : > { %3876 = vmatmul.msk.bf16.gmra.mxu2 %vm1573_vm0, %v4949_v0 }
  0xdb   : > { %1800 = vmatmul.bf16.gmra.mxu3 %v4877_v15 }
  0xe8   : > { %1721 = vmatmul.bf16.gmra.mxu0 %v4959_v38 }
  0xe9   : > { %1749 = vmatmul.bf16.gmra.mxu1 %v4961_v40 }
  0xea   : > { %3877 = vmatmul.msk.bf16.gmra.mxu2 %vm1573_vm0, %v4963_v41 }
  0xeb   : > { %1805 = vmatmul.bf16.gmra.mxu3 %v4893_v54 }
  0xf4   : > { %v1595_v9 = vpop.f32.mrf.mxu0 }
  0xf5   : > { %v1596_v13 = vadd.f32 %v1595_v9, %v4973_v6 }
  0xf6   : > { %v1623_v14 = vpop.f32.mrf.mxu1 }
  0xf7   : > { %v1624_v19 = vadd.f32 %v1623_v14, %v1596_v13 }
  0xf8   : > { %1818 = vmatmul.bf16.vlgmr.msra.gmra.mxu0 %v4839_v51 }
  0xf9   : > { %1846 = vmatmul.bf16.vlgmr.msra.gmra.mxu1 %v4841_v52 }
  0xfa   : > { %1874 = vmatmul.bf16.vlgmr.msra.gmra.mxu2 %v4843_v55 }
  0xfb   : > { %1902 = vmatmul.bf16.vlgmr.msra.gmra.mxu3 %v4911_v29  ;;  %2090 = vmatpush.bf16.msra.mxu2 %v3725_v25 }
  0xfc   : > { %v1597_v42 = vpop.f32.mrf.mxu0 }
  0xfd   : > { %v1651_v27 = vpop.f32.mrf.mxu2  ;;  %v1598_v43 = vadd.f32 %v1597_v42, %v4973_v6 }
  0xfe   : > { %v1652_v34 = vadd.f32 %v1651_v27, %v1624_v19  ;;  %v1679_v37 = vpop.f32.mrf.mxu3  ;;  %v1625_v44 = vpop.f32.mrf.mxu1 }
  0xff   : > { %v1626_v46 = vadd.f32 %v1625_v44, %v1598_v43 }
 0x100   : > { %v4981_v45 = vadd.f32 %v1679_v37, %v1652_v34 }
 0x105   : > { %v1653_v4 = vpop.f32.mrf.mxu2  ;;  %v1600_v8 = vpop.f32.mrf.mxu0 }
 0x106   : > { %v1654_v5 = vadd.f32 %v1653_v4, %v1626_v46  ;;  %v1681_v7 = vpop.f32.mrf.mxu3  ;;  %v1601_v9 = vadd.f32 %v1600_v8, %v4973_v6  ;;  %v1628_v13 = vpop.f32.mrf.mxu1  ;;  %v3229_v4 = vor.u32 %v4065_v2, %v3228_v1  ;;  %v3708_v2 = vld [vmem:[#allocation4 + $0x4c8] sm:$0xf] }
 0x108   : > { %v4984_v14 = vadd.f32 %v1681_v7, %v1654_v5  ;;  %v1629_v19 = vadd.f32 %v1628_v13, %v1601_v9  ;;  %1823 = vmatmul.bf16.gmra.mxu0 %v4859_v35  ;;  %2013 = vmatpush.bf16.msrb.mxu3 %v3229_v4  ;;  %v3452_v4 = vld [vmem:[#allocation4 + $0x2c8] sm:$0xf] }
 0x109   : > { %1851 = vmatmul.bf16.gmra.mxu1 %v4861_v36 }
 0x10a   : > { %1879 = vmatmul.bf16.gmra.mxu2 %v4863_v39 }
 0x10b   : > { %1907 = vmatmul.bf16.gmra.mxu3 %v4928_v10 }
 0x10d   : > { %v1656_v27 = vpop.f32.mrf.mxu2  ;;  %v1602_v42 = vpop.f32.mrf.mxu0 }
 0x10e   : > { %v1657_v34 = vadd.f32 %v1656_v27, %v1629_v19  ;;  %v1684_v37 = vpop.f32.mrf.mxu3  ;;  %v1603_v43 = vadd.f32 %v1602_v42, %v4973_v6  ;;  %v1630_v44 = vpop.f32.mrf.mxu1  ;;  %v3852_v27 = vld [vmem:[#allocation4 + $0x5e8] sm:$0xf] }
 0x110   : > { %v4991_v46 = vadd.f32 %v1684_v37, %v1657_v34  ;;  %v1631_v53 = vadd.f32 %v1630_v44, %v1603_v43  ;;  %v3469_v34 = vor.u32 %v4125_v26, %v3468_v24  ;;  %v3853_v37 = vor.u32 %v4221_v28, %v3852_v27 }
 0x112   : > { %2034 = vmatpush.bf16.msra.mxu0 %v3469_v34  ;;  %2118 = vmatpush.bf16.msra.mxu3 %v3853_v37  ;;  %v4153_v34 = vld [vmem:[#allocation4 + $0x3d4] sm:$0xf0] }
 0x115   : > { %v1658_v5 = vpop.f32.mrf.mxu2  ;;  %v1605_v9 = vpop.f32.mrf.mxu0 }
 0x116   : > { %v1659_v7 = vadd.f32 %v1658_v5, %v1631_v53  ;;  %v1686_v8 = vpop.f32.mrf.mxu3  ;;  %v1606_v13 = vadd.f32 %v1605_v9, %v4973_v6  ;;  %v1633_v19 = vpop.f32.mrf.mxu1  ;;  %v3596_v53 = vld [vmem:[#allocation4 + $0x3e8] sm:$0xf]  ;;  %v3709_v5 = vor.u32 %v4185_v3, %v3708_v2  ;;  %v4217_v9 = vld [vmem:[#allocation4 + $0x5d4] sm:$0xf0] }
 0x117   : > { %v3597_v1 = vor.u32 %v4157_v60, %v3596_v53  ;;  %v4213_v53 = vld [vmem:[#allocation4 + $0x5b4] sm:$0xf0] }
 0x118   : > { %v4994_v20 = vadd.f32 %v1686_v8, %v1659_v7  ;;  %v1634_v21 = vadd.f32 %v1633_v19, %v1606_v13  ;;  %1828 = vmatmul.bf16.gmra.mxu0 %v4879_v16  ;;  %v4121_v7 = vld [vmem:[#allocation4 + $0x2d4] sm:$0xf0]  ;;  %v3836_v8 = vld [vmem:[#allocation4 + $0x5c8] sm:$0xf]  ;;  %2091 = vmatpush.bf16.msra.mxu2 %v3709_v5 }
 0x119   : > { %1856 = vmatmul.bf16.gmra.mxu1 %v4881_v17  ;;  %v3453_v13 = vor.u32 %v4121_v7, %v3452_v4  ;;  %v3837_v19 = vor.u32 %v4217_v9, %v3836_v8  ;;  %v3564_v8 = vld [vmem:[#allocation4 + $0x3a8] sm:$0xf]  ;;  %v4149_v9 = vld [vmem:[#allocation4 + $0x3b4] sm:$0xf0] }
 0x11a   : > { %1884 = vmatmul.bf16.gmra.mxu2 %v4883_v18  ;;  %2062 = vmatpush.bf16.msra.mxu1 %v3597_v1 }
 0x11b   : > { %1912 = vmatmul.bf16.gmra.mxu3 %v4945_v62  ;;  %2035 = vmatpush.bf16.msra.mxu0 %v3453_v13  ;;  %v3565_v13 = vor.u32 %v4149_v9, %v3564_v8 }
 0x11c   : > { %2119 = vmatpush.bf16.msra.mxu3 %v3837_v19  ;;  %v3676_v19 = vld [vmem:[#allocation4 + $0x488] sm:$0xf] }
 0x11d   : > { %v1661_v33 = vpop.f32.mrf.mxu2  ;;  %v1607_v44 = vpop.f32.mrf.mxu0 }
 0x11e   : > { %v1662_v42 = vadd.f32 %v1661_v33, %v1634_v21  ;;  %v1689_v43 = vpop.f32.mrf.mxu3  ;;  %v1608_v48 = vadd.f32 %v1607_v44, %v4973_v6  ;;  %v1635_v49 = vpop.f32.mrf.mxu1  ;;  %v3580_v33 = vld [vmem:[#allocation4 + $0x3c8] sm:$0xf] }
 0x11f   : > { %v3581_v37 = vor.u32 %v4153_v34, %v3580_v33  ;;  %v3436_v44 = vld [vmem:[#allocation4 + $0x2a8] sm:$0xf] }
 0x120   : > { %v5001_v50 = vadd.f32 %v1689_v43, %v1662_v42  ;;  %v1636_v61 = vadd.f32 %v1635_v49, %v1608_v48  ;;  %v3692_v42 = vld [vmem:[#allocation4 + $0x4a8] sm:$0xf]  ;;  %v4181_v43 = vld [vmem:[#allocation4 + $0x4b4] sm:$0xf0] }
 0x121   : > { %v3693_v48 = vor.u32 %v4181_v43, %v3692_v42  ;;  %v3820_v49 = vld [vmem:[#allocation4 + $0x5a8] sm:$0xf]  ;;  %2063 = vmatpush.bf16.msra.mxu1 %v3581_v37 }
 0x122   : > { %v3821_v1 = vor.u32 %v4213_v53, %v3820_v49 }
 0x123   : > { %2092 = vmatpush.bf16.msra.mxu2 %v3693_v48  ;;  %v3548_v48 = vld [vmem:[#allocation4 + $0x388] sm:$0xf] }
 0x124   : > { %2120 = vmatpush.bf16.msra.mxu3 %v3821_v1  ;;  %v3404_v1 = vld [vmem:[#allocation4 + $0x268] sm:$0xf] }
 0x125   : > { %v1663_v21 = vpop.f32.mrf.mxu2  ;;  %v1610_v24 = vpop.f32.mrf.mxu0  ;;  %2064 = vmatpush.bf16.msra.mxu1 %v3565_v13 }
 0x126   : > { %v1664_v22 = vadd.f32 %v1663_v21, %v1636_v61  ;;  %v1691_v23 = vpop.f32.mrf.mxu3  ;;  %v1611_v25 = vadd.f32 %v1610_v24, %v4973_v6  ;;  %v1638_v26 = vpop.f32.mrf.mxu1  ;;  %v4117_v6 = vld [vmem:[#allocation4 + $0x2b4] sm:$0xf0] }
 0x127   : > { %v3437_v61 = vor.u32 %v4117_v6, %v3436_v44  ;;  %v4177_v21 = vld [vmem:[#allocation4 + $0x494] sm:$0xf0] }
 0x128   : > { %v5004_v27 = vadd.f32 %v1691_v23, %v1664_v22  ;;  %v1639_v28 = vadd.f32 %v1638_v26, %v1611_v25  ;;  %1833 = vmatmul.bf16.gmra.mxu0 %v4895_v56  ;;  %v3420_v22 = vld [vmem:[#allocation4 + $0x288] sm:$0xf]  ;;  %v3677_v23 = vor.u32 %v4177_v21, %v3676_v19  ;;  %v4113_v24 = vld [vmem:[#allocation4 + $0x294] sm:$0xf0] }
 0x129   : > { %1861 = vmatmul.bf16.gmra.mxu1 %v4897_v57  ;;  %2036 = vmatpush.bf16.msra.mxu0 %v3437_v61  ;;  %v3804_v25 = vld [vmem:[#allocation4 + $0x588] sm:$0xf]  ;;  %v4209_v26 = vld [vmem:[#allocation4 + $0x594] sm:$0xf0] }
 0x12a   : > { %1889 = vmatmul.bf16.gmra.mxu2 %v4899_v58  ;;  %v3805_v33 = vor.u32 %v4209_v26, %v3804_v25  ;;  %v4145_v6 = vld [vmem:[#allocation4 + $0x394] sm:$0xf0] }
 0x12b   : > { %1917 = vmatmul.bf16.gmra.mxu3 %v4959_v38  ;;  %2093 = vmatpush.bf16.msra.mxu2 %v3677_v23  ;;  %v3549_v53 = vor.u32 %v4145_v6, %v3548_v48  ;;  %v4173_v61 = vld [vmem:[#allocation4 + $0x474] sm:$0xf0] }
 0x12c   : > { %2121 = vmatpush.bf16.msra.mxu3 %v3805_v33  ;;  %v4141_v25 = vld [vmem:[#allocation4 + $0x374] sm:$0xf0]  ;;  %v3644_v33 = vld [vmem:[#allocation4 + $0x448] sm:$0xf] }
 0x12d   : > { %v1666_v60 = vpop.f32.mrf.mxu2  ;;  %v1612_v4 = vpop.f32.mrf.mxu0  ;;  %2065 = vmatpush.bf16.msra.mxu1 %v3549_v53  ;;  %v4201_v48 = vld [vmem:[#allocation4 + $0x554] sm:$0xf0] }
 0x12e   : > { %v1667_v2 = vadd.f32 %v1666_v60, %v1639_v28  ;;  %v1694_v3 = vpop.f32.mrf.mxu3  ;;  %v1640_v5 = vpop.f32.mrf.mxu1  ;;  %v3421_v28 = vor.u32 %v4113_v24, %v3420_v22  ;;  %v3660_v60 = vld [vmem:[#allocation4 + $0x468] sm:$0xf]  ;;  %v4205_v4 = vld [vmem:[#allocation4 + $0x574] sm:$0xf0] }
 0x12f   : > { %v3532_v24 = vld [vmem:[#allocation4 + $0x368] sm:$0xf] }
 0x130   : > { %v5010_v7 = vadd.f32 %v1694_v3, %v1667_v2  ;;  %2037 = vmatpush.bf16.msra.mxu0 %v3421_v28  ;;  %v3661_v2 = vor.u32 %v4173_v61, %v3660_v60  ;;  %v3788_v3 = vld [vmem:[#allocation4 + $0x568] sm:$0xf]  ;;  %v3533_v28 = vor.u32 %v4141_v25, %v3532_v24  ;;  %v4101_v24 = vld [vmem:[#allocation4 + $0x234] sm:$0xf0] }
 0x131   : > { %v3789_v9 = vor.u32 %v4205_v4, %v3788_v3  ;;  %v3516_v4 = vld [vmem:[#allocation4 + $0x348] sm:$0xf] }
 0x132   : > { %2094 = vmatpush.bf16.msra.mxu2 %v3661_v2  ;;  %2066 = vmatpush.bf16.msra.mxu1 %v3533_v28  ;;  %v3756_v25 = vld [vmem:[#allocation4 + $0x528] sm:$0xf] }
 0x133   : > { %2122 = vmatpush.bf16.msra.mxu3 %v3789_v9 }
 0x135   : > { %v1668_v34 = vpop.f32.mrf.mxu2  ;;  %v1707_v42 = vpop.f32.mrf.mxu0 }
 0x136   : > { %v1696_v37 = vpop.f32.mrf.mxu3  ;;  %v1708_v43 = vadd.f32 %v1707_v42, %v4981_v45  ;;  %v1735_v44 = vpop.f32.mrf.mxu1  ;;  %v4109_v45 = vld [vmem:[#allocation4 + $0x274] sm:$0xf0] }
 0x137   : > { %v3405_v8 = vor.u32 %v4109_v45, %v3404_v1  ;;  %v4169_v34 = vld [vmem:[#allocation4 + $0x454] sm:$0xf0]  ;;  %v3388_v37 = vld [vmem:[#allocation4 + $0x248] sm:$0xf] }
 0x138   : > { %v1736_v49 = vadd.f32 %v1735_v44, %v1708_v43  ;;  %1930 = vmatmul.bf16.vlgmr.msrb.gmra.mxu0 %v4913_v30  ;;  %v3645_v42 = vor.u32 %v4169_v34, %v3644_v33  ;;  %v4105_v43 = vld [vmem:[#allocation4 + $0x254] sm:$0xf0]  ;;  %v3772_v44 = vld [vmem:[#allocation4 + $0x548] sm:$0xf] }
 0x139   : > { %3878 = vmatmul.msk.bf16.vlgmr.msrb.gmra.mxu1 %vm1573_vm0, %v4915_v32  ;;  %2038 = vmatpush.bf16.msra.mxu0 %v3405_v8  ;;  %v3389_v6 = vor.u32 %v4105_v43, %v3388_v37 }
 0x13a   : > { %1986 = vmatmul.bf16.vlgmr.msrb.gmra.mxu2 %v4837_v47 }
 0x13b   : > { %2014 = vmatmul.bf16.vlgmr.msrb.gmra.mxu3 %v4839_v51  ;;  %2095 = vmatpush.bf16.msra.mxu2 %v3645_v42 }
 0x13d   : > { %v1763_v5 = vpop.f32.mrf.mxu2  ;;  %v1709_v21 = vpop.f32.mrf.mxu0  ;;  %2039 = vmatpush.bf16.msra.mxu0 %v3389_v6 }
 0x13e   : > { %v1764_v13 = vadd.f32 %v1763_v5, %v1736_v49  ;;  %v5018_v19 = vpop.f32.mrf.mxu3  ;;  %v1710_v22 = vadd.f32 %v1709_v21, %v4984_v14  ;;  %v1737_v23 = vpop.f32.mrf.mxu1  ;;  %v3773_v49 = vor.u32 %v4201_v48, %v3772_v44  ;;  %v4137_v5 = vld [vmem:[#allocation4 + $0x354] sm:$0xf0] }
 0x13f   : > { %v3517_v9 = vor.u32 %v4137_v5, %v3516_v4  ;;  %v3740_v4 = vld [vmem:[#allocation4 + $0x508] sm:$0xf]  ;;  %v4193_v5 = vld [vmem:[#allocation4 + $0x514] sm:$0xf0] }
 0x140   : > { %v1738_v26 = vadd.f32 %v1737_v23, %v1710_v22  ;;  %2123 = vmatpush.bf16.msra.mxu3 %v3773_v49  ;;  %v2370_v45 = vmax.f32 %v1764_v13, 0.0  ;;  %v4165_v22 = vld [vmem:[#allocation4 + $0x434] sm:$0xf0]  ;;  %v3372_v13 = vld [vmem:[#allocation4 + $0x228] sm:$0xf] }
 0x141   : > { %2067 = vmatpush.bf16.msra.mxu1 %v3517_v9  ;;  %v3373_v33 = vor.u32 %v4101_v24, %v3372_v13  ;;  %v3500_v49 = vld [vmem:[#allocation4 + $0x328] sm:$0xf]  ;;  %v3741_v9 = vor.u32 %v4193_v5, %v3740_v4 }
 0x143   : > { %2040 = vmatpush.bf16.msra.mxu0 %v3373_v33 }
 0x145   : > { %v1765_v53 = vpop.f32.mrf.mxu2  ;;  %v1712_v61 = vpop.f32.mrf.mxu0 }
 0x146   : > { %v1766_v14 = vadd.f32 %v1765_v53, %v1738_v26  ;;  %v5021_v60 = vpop.f32.mrf.mxu3  ;;  %v1713_v1 = vadd.f32 %v1712_v61, %v4991_v46  ;;  %v1740_v2 = vpop.f32.mrf.mxu1  ;;  %v3628_v46 = vld [vmem:[#allocation4 + $0x428] sm:$0xf]  ;;  %v4197_v26 = vld [vmem:[#allocation4 + $0x534] sm:$0xf0] }
 0x147   : > { %v3629_v23 = vor.u32 %v4165_v22, %v3628_v46  ;;  %v3757_v34 = vor.u32 %v4197_v26, %v3756_v25  ;;  %v4133_v53 = vld [vmem:[#allocation4 + $0x334] sm:$0xf0]  ;;  %v3612_v61 = vld [vmem:[#allocation4 + $0x408] sm:$0xf] }
 0x148   : > { %v2374_v3 = vmax.f32 %v1766_v14, 0.0  ;;  %v1741_v8 = vadd.f32 %v1740_v2, %v1713_v1  ;;  %1935 = vmatmul.bf16.gmra.mxu0 %v4930_v11  ;;  %v3501_v14 = vor.u32 %v4133_v53, %v3500_v49  ;;  %v4161_v1 = vld [vmem:[#allocation4 + $0x414] sm:$0xf0]  ;;  %v3356_v2 = vld [vmem:[#allocation4 + $0x208] sm:$0xf] }
 0x149   : > { %3879 = vmatmul.msk.bf16.gmra.mxu1 %vm1573_vm0, %v4932_v12  ;;  %2096 = vmatpush.bf16.msra.mxu2 %v3629_v23  ;;  %v4129_v22 = vld [vmem:[#allocation4 + $0x314] sm:$0xf0]  ;;  %v3868_v49 = vld [vmem:[#allocation4 + $0x608] sm:$0xf] }
 0x14a   : > { %v5025_v21 = vpack.c.bf16 %v2374_v3, %v2370_v45  ;;  %1991 = vmatmul.bf16.gmra.mxu2 %v4857_v31  ;;  %2124 = vmatpush.bf16.msra.mxu3 %v3757_v34  ;;  %v3613_v45 = vor.u32 %v4161_v1, %v3612_v61  ;;  %v4097_v3 = vld [vmem:[#allocation4 + $0x214] sm:$0xf0] }
 0x14b   : > { %2019 = vmatmul.bf16.gmra.mxu3 %v4859_v35  ;;  %2068 = vmatpush.bf16.msra.mxu1 %v3501_v14  ;;  %v4225_v53 = vld [vmem:[#allocation4 + $0x614] sm:$0xf0]  ;;  %v3470_v14 = vld [vmem:[#allocation4 + $0x2f8] sm:$0xf0] }
 0x14c   : > { %v3869_v1 = vor.u32 %v4225_v53, %v3868_v49 }
 0x14d   : > { %v1768_v28 = vpop.f32.mrf.mxu2  ;;  %v1714_v43 = vpop.f32.mrf.mxu0  ;;  %2097 = vmatpush.bf16.msra.mxu2 %v3613_v45 }
 0x14e   : > { %v1769_v37 = vadd.f32 %v1768_v28, %v1741_v8  ;;  %v5031_v42 = vpop.f32.mrf.mxu3  ;;  %v1715_v44 = vadd.f32 %v1714_v43, %v4994_v20  ;;  %v1742_v48 = vpop.f32.mrf.mxu1  ;;  %v3357_v8 = vor.u32 %v4097_v3, %v3356_v2  ;;  %v3484_v20 = vld [vmem:[#allocation4 + $0x308] sm:$0xf]  ;;  %2125 = vmatpush.bf16.msra.mxu3 %v3741_v9  ;;  %v4059_v9 = vld [vmem:[#allocation4 + $0xec] sm:$0xf] }
 0x14f   : > { %v3485_v25 = vor.u32 %v4129_v22, %v3484_v20 }
 0x150   : > { %v1743_v6 = vadd.f32 %v1742_v48, %v1715_v44  ;;  %2041 = vmatpush.bf16.msra.mxu0 %v3357_v8  ;;  %v2378_v33 = vmax.f32 %v1769_v37, 0.0  ;;  %v4091_v48 = vld [vmem:[#allocation4 + $0x1ec] sm:$0xf] }
 0x151   : > { %2069 = vmatpush.bf16.msra.mxu1 %v3485_v25  ;;  %v4123_v37 = vld [vmem:[#allocation4 + $0x2ec] sm:$0xf] }
 0x152   : > { %v3473_v2 = vor.u32 %v4123_v37, %v3470_v14  ;;  %v4119_v25 = vld [vmem:[#allocation4 + $0x2cc] sm:$0xf]  ;;  %v3198_v14 = vld [vmem:[#allocation4 + $0xd8] sm:$0xf0] }
 0x153   : > { %v4055_v37 = vld [vmem:[#allocation4 + $0xcc] sm:$0xf] }
 0x154   : > { %2153 = vmatpush.bf16.msrb.mxu0 %v3869_v1  ;;  %2230 = vmatpush.bf16.msrb.mxu3 %v3473_v2  ;;  %v3201_v1 = vor.u32 %v4055_v37, %v3198_v14 }
 0x155   : > { %v1770_v46 = vpop.f32.mrf.mxu2  ;;  %v1717_v24 = vpop.f32.mrf.mxu0 }
 0x156   : > { %v1771_v13 = vadd.f32 %v1770_v46, %v1743_v6  ;;  %v5034_v23 = vpop.f32.mrf.mxu3  ;;  %v1718_v26 = vadd.f32 %v1717_v24, %v5001_v50  ;;  %v1745_v28 = vpop.f32.mrf.mxu1  ;;  %v3342_v6 = vld [vmem:[#allocation4 + $0x1f8] sm:$0xf0] }
 0x157   : > { %v3345_v50 = vor.u32 %v4091_v48, %v3342_v6  ;;  %v3214_v46 = vld [vmem:[#allocation4 + $0xf8] sm:$0xf0] }
 0x158   : > { %v2382_v34 = vmax.f32 %v1771_v13, 0.0  ;;  %v1746_v43 = vadd.f32 %v1745_v28, %v1718_v26  ;;  %1940 = vmatmul.bf16.gmra.mxu0 %v4947_v63  ;;  %v3217_v22 = vor.u32 %v4059_v9, %v3214_v46  ;;  %v4087_v13 = vld [vmem:[#allocation4 + $0x1cc] sm:$0xf]  ;;  %v3326_v24 = vld [vmem:[#allocation4 + $0x1d8] sm:$0xf0] }
 0x159   : > { %3880 = vmatmul.msk.bf16.gmra.mxu1 %vm1573_vm0, %v4949_v0  ;;  %2202 = vmatpush.bf16.msrb.mxu2 %v3345_v50  ;;  %v3329_v26 = vor.u32 %v4087_v13, %v3326_v24  ;;  %v3454_v28 = vld [vmem:[#allocation4 + $0x2d8] sm:$0xf0] }
 0x15a   : > { %1996 = vmatmul.bf16.gmra.mxu2 %v4877_v15  ;;  %v5041_v44 = vpack.c.bf16 %v2382_v34, %v2378_v33  ;;  %2174 = vmatpush.bf16.msrb.mxu1 %v3217_v22  ;;  %v3457_v33 = vor.u32 %v4119_v25, %v3454_v28  ;;  %v5062_v25 = vperm.slane %v4970_v59, 1  ;;  %v3182_v28 = vld [vmem:[#allocation4 + $0xb8] sm:$0xf0] }
 0x15b   : > { %2024 = vmatmul.bf16.gmra.mxu3 %v4879_v16 }
 0x15c   : > { %2231 = vmatpush.bf16.msrb.mxu3 %v3457_v33 }
 0x15d   : > { %v1773_v61 = vpop.f32.mrf.mxu2  ;;  %v1719_v4 = vpop.f32.mrf.mxu0  ;;  %2203 = vmatpush.bf16.msrb.mxu2 %v3329_v26  ;;  %v4051_v26 = vld [vmem:[#allocation4 + $0xac] sm:$0xf] }
 0x15e   : > { %v1774_v45 = vadd.f32 %v1773_v61, %v1746_v43  ;;  %v5044_v3 = vpop.f32.mrf.mxu3  ;;  %v1720_v5 = vadd.f32 %v1719_v4, %v5004_v27  ;;  %v1747_v8 = vpop.f32.mrf.mxu1  ;;  %2175 = vmatpush.bf16.msrb.mxu1 %v3201_v1  ;;  %v3310_v4 = vld [vmem:[#allocation4 + $0x1b8] sm:$0xf0]  ;;  %v3185_v33 = vor.u32 %v4051_v26, %v3182_v28 }
 0x160   : > { %v1748_v20 = vadd.f32 %v1747_v8, %v1720_v5  ;;  %v2386_v50 = vmax.f32 %v1774_v45, 0.0  ;;  %v4115_v45 = vld [vmem:[#allocation4 + $0x2ac] sm:$0xf]  ;;  %v3438_v8 = vld [vmem:[#allocation4 + $0x2b8] sm:$0xf0] }
 0x161   : > { %v3441_v46 = vor.u32 %v4115_v45, %v3438_v8  ;;  %v3278_v8 = vld [vmem:[#allocation4 + $0x178] sm:$0xf0] }
 0x162   : > { %2176 = vmatpush.bf16.msrb.mxu1 %v3185_v33 }
 0x163   : > { %2232 = vmatpush.bf16.msrb.mxu3 %v3441_v46 }
 0x165   : > { %v1775_v34 = vpop.f32.mrf.mxu2  ;;  %v1722_v27 = vpop.f32.mrf.mxu0 }
 0x166   : > { %v1776_v43 = vadd.f32 %v1775_v34, %v1748_v20  ;;  %v5047_v48 = vpop.f32.mrf.mxu3  ;;  %v1723_v6 = vadd.f32 %v1722_v27, %v5010_v7  ;;  %v1750_v49 = vpop.f32.mrf.mxu1  ;;  %v4083_v7 = vld [vmem:[#allocation4 + $0x1ac] sm:$0xf] }
 0x167   : > { %v3313_v5 = vor.u32 %v4083_v7, %v3310_v4  ;;  %v4079_v34 = vld [vmem:[#allocation4 + $0x18c] sm:$0xf]  ;;  %v3166_v4 = vld [vmem:[#allocation4 + $0x98] sm:$0xf0] }
 0x168   : > { %v2390_v53 = vmax.f32 %v1776_v43, 0.0  ;;  %v1751_v61 = vadd.f32 %v1750_v49, %v1723_v6  ;;  %1945 = vmatmul.bf16.gmra.mxu0 %v4961_v40  ;;  %v3294_v43 = vld [vmem:[#allocation4 + $0x198] sm:$0xf0]  ;;  %v4111_v27 = vld [vmem:[#allocation4 + $0x28c] sm:$0xf] }
 0x169   : > { %3881 = vmatmul.msk.bf16.gmra.mxu1 %vm1573_vm0, %v4963_v41  ;;  %2204 = vmatpush.bf16.msrb.mxu2 %v3313_v5  ;;  %v3297_v6 = vor.u32 %v4079_v34, %v3294_v43  ;;  %v3422_v49 = vld [vmem:[#allocation4 + $0x298] sm:$0xf0]  ;;  %v4047_v7 = vld [vmem:[#allocation4 + $0x8c] sm:$0xf] }
 0x16a   : > { %2001 = vmatmul.bf16.gmra.mxu2 %v4893_v54  ;;  %v5054_v2 = vpack.c.bf16 %v2390_v53, %v2386_v50  ;;  %v3425_v50 = vor.u32 %v4111_v27, %v3422_v49  ;;  %v1792_v53 = vadd.f32 %v5018_v19, %v5062_v25  ;;  %v3169_v5 = vor.u32 %v4047_v7, %v3166_v4  ;;  %v4075_v19 = vld [vmem:[#allocation4 + $0x16c] sm:$0xf] }
 0x16b   : > { %2029 = vmatmul.bf16.gmra.mxu3 %v4895_v56  ;;  %v3281_v46 = vor.u32 %v4075_v19, %v3278_v8 }
 0x16c   : > { %2233 = vmatpush.bf16.msrb.mxu3 %v3425_v50  ;;  %2177 = vmatpush.bf16.msrb.mxu1 %v3169_v5  ;;  %v4043_v50 = vld [vmem:[#allocation4 + $0x6c] sm:$0xf] }
 0x16d   : > { %v1778_v9 = vpop.f32.mrf.mxu2  ;;  %v1724_v13 = vpop.f32.mrf.mxu0  ;;  %2205 = vmatpush.bf16.msrb.mxu2 %v3297_v6 }
 0x16e   : > { %v5057_v20 = vadd.f32 %v1778_v9, %v1751_v61  ;;  %v5059_v22 = vpop.f32.mrf.mxu3  ;;  %v1752_v24 = vpop.f32.mrf.mxu1  ;;  %v4107_v9 = vld [vmem:[#allocation4 + $0x26c] sm:$0xf]  ;;  %v3406_v13 = vld [vmem:[#allocation4 + $0x278] sm:$0xf0] }
 0x16f   : > { %v1794_v24 = vadd.f32 %v5021_v60, %v5062_v25  ;;  %v3409_v28 = vor.u32 %v4107_v9, %v3406_v13  ;;  %v3390_v60 = vld [vmem:[#allocation4 + $0x258] sm:$0xf0] }
 0x171   : > { %2206 = vmatpush.bf16.msrb.mxu2 %v3281_v46  ;;  %2234 = vmatpush.bf16.msrb.mxu3 %v3409_v28  ;;  %v3134_v28 = vld [vmem:[#allocation4 + $0x58] sm:$0xf0] }
 0x175   : > { %v1780_v37 = vpop.f32.mrf.mxu2  ;;  %v1819_v61 = vpop.f32.mrf.mxu0 }
 0x176   : > { %v1808_v14 = vpop.f32.mrf.mxu3  ;;  %v1820_v59 = vadd.f32 %v1819_v61, %v1792_v53  ;;  %v1847_v1 = vpop.f32.mrf.mxu1  ;;  %v3150_v53 = vld [vmem:[#allocation4 + $0x78] sm:$0xf0]  ;;  %v4071_v61 = vld [vmem:[#allocation4 + $0x14c] sm:$0xf] }
 0x177   : > { %v3153_v14 = vor.u32 %v4043_v50, %v3150_v53  ;;  %v3374_v50 = vld [vmem:[#allocation4 + $0x238] sm:$0xf0]  ;;  %v1799_v53 = vadd.f32 %v5034_v23, %v5062_v25 }
 0x178   : > { %v1848_v45 = vadd.f32 %v1847_v1, %v1820_v59  ;;  %2042 = vmatmul.bf16.vlgmr.msra.gmra.mxu0 %v4841_v52  ;;  %v3262_v59 = vld [vmem:[#allocation4 + $0x158] sm:$0xf0]  ;;  %v4103_v1 = vld [vmem:[#allocation4 + $0x24c] sm:$0xf] }
 0x179   : > { %2070 = vmatmul.bf16.vlgmr.msra.gmra.mxu1 %v4843_v55  ;;  %v3265_v7 = vor.u32 %v4071_v61, %v3262_v59  ;;  %v3393_v4 = vor.u32 %v4103_v1, %v3390_v60 }
 0x17a   : > { %2098 = vmatmul.bf16.vlgmr.msra.gmra.mxu2 %v4911_v29  ;;  %2178 = vmatpush.bf16.msrb.mxu1 %v3153_v14 }
 0x17b   : > { %2126 = vmatmul.bf16.vlgmr.msra.gmra.mxu3 %v4913_v30  ;;  %2207 = vmatpush.bf16.msrb.mxu2 %v3265_v7 }
 0x17c   : > { %2235 = vmatpush.bf16.msrb.mxu3 %v3393_v4 }
 0x17d   : > { %v1875_v26 = vpop.f32.mrf.mxu2  ;;  %v1821_v43 = vpop.f32.mrf.mxu0 }
 0x17e   : > { %v1876_v33 = vadd.f32 %v1875_v26, %v1848_v45  ;;  %v1903_v34 = vpop.f32.mrf.mxu3  ;;  %v1822_v27 = vadd.f32 %v1821_v43, %v1794_v24  ;;  %v1849_v6 = vpop.f32.mrf.mxu1  ;;  %v1797_v45 = vadd.f32 %v5031_v42, %v5062_v25  ;;  %v4039_v26 = vld [vmem:[#allocation4 + $0x4c] sm:$0xf]  ;;  %v3246_v43 = vld [vmem:[#allocation4 + $0x138] sm:$0xf0] }
 0x17f   : > { %v4067_v42 = vld [vmem:[#allocation4 + $0x12c] sm:$0xf] }
 0x180   : > { %v5072_v49 = vadd.f32 %v1903_v34, %v1876_v33  ;;  %v1850_v37 = vadd.f32 %v1849_v6, %v1822_v27  ;;  %v3137_v34 = vor.u32 %v4039_v26, %v3134_v28  ;;  %v4099_v27 = vld [vmem:[#allocation4 + $0x22c] sm:$0xf]  ;;  %v3249_v6 = vor.u32 %v4067_v42, %v3246_v43  ;;  %v3358_v26 = vld [vmem:[#allocation4 + $0x218] sm:$0xf0] }
 0x181   : > { %v3377_v14 = vor.u32 %v4099_v27, %v3374_v50  ;;  %v4031_v42 = vld [vmem:[#allocation4 + $0xc] sm:$0xf]  ;;  %v3102_v43 = vld [vmem:[#allocation4 + $0x18] sm:$0xf0] }
 0x182   : > { %2179 = vmatpush.bf16.msrb.mxu1 %v3137_v34  ;;  %2208 = vmatpush.bf16.msrb.mxu2 %v3249_v6 }
 0x183   : > { %2236 = vmatpush.bf16.msrb.mxu3 %v3377_v14 }
 0x185   : > { %v1877_v5 = vpop.f32.mrf.mxu2  ;;  %v1824_v9 = vpop.f32.mrf.mxu0 }
 0x186   : > { %v1878_v19 = vadd.f32 %v1877_v5, %v1850_v37  ;;  %v1905_v8 = vpop.f32.mrf.mxu3  ;;  %v1825_v46 = vadd.f32 %v1824_v9, %v1797_v45  ;;  %v1852_v13 = vpop.f32.mrf.mxu1  ;;  %v4035_v45 = vld [vmem:[#allocation4 + $0x2c] sm:$0xf]  ;;  %v3118_v5 = vld [vmem:[#allocation4 + $0x38] sm:$0xf0] }
 0x187   : > { %v3121_v9 = vor.u32 %v4035_v45, %v3118_v5  ;;  %v3598_v45 = vld [vmem:[#allocation4 + $0x3f8] sm:$0xf0]  ;;  %v4223_v5 = vld [vmem:[#allocation4 + $0x60c] sm:$0xf] }
 0x188   : > { %v5076_v24 = vadd.f32 %v1905_v8, %v1878_v19  ;;  %v1853_v33 = vadd.f32 %v1852_v13, %v1825_v46  ;;  %2047 = vmatmul.bf16.gmra.mxu0 %v4861_v36  ;;  %v4063_v19 = vld [vmem:[#allocation4 + $0x10c] sm:$0xf]  ;;  %v3230_v46 = vld [vmem:[#allocation4 + $0x118] sm:$0xf0] }
 0x189   : > { %2075 = vmatmul.bf16.gmra.mxu1 %v4863_v39  ;;  %v4095_v13 = vld [vmem:[#allocation4 + $0x20c] sm:$0xf]  ;;  %v3233_v23 = vor.u32 %v4063_v19, %v3230_v46  ;;  %v3870_v19 = vld [vmem:[#allocation4 + $0x618] sm:$0xf0] }
 0x18a   : > { %2103 = vmatmul.bf16.gmra.mxu2 %v4928_v10  ;;  %v3361_v28 = vor.u32 %v4095_v13, %v3358_v26  ;;  %2180 = vmatpush.bf16.msrb.mxu1 %v3121_v9  ;;  %v3873_v13 = vor.u32 %v4223_v5, %v3870_v19 }
 0x18b   : > { %2131 = vmatmul.bf16.gmra.mxu3 %v4930_v11  ;;  %2209 = vmatpush.bf16.msrb.mxu2 %v3233_v23 }
 0x18c   : > { %2237 = vmatpush.bf16.msrb.mxu3 %v3361_v28 }
 0x18d   : > { %v1880_v37 = vpop.f32.mrf.mxu2  ;;  %v1826_v1 = vpop.f32.mrf.mxu0 }
 0x18e   : > { %v1881_v61 = vadd.f32 %v1880_v37, %v1853_v33  ;;  %v1908_v59 = vpop.f32.mrf.mxu3  ;;  %v1827_v7 = vadd.f32 %v1826_v1, %v1799_v53  ;;  %v1854_v60 = vpop.f32.mrf.mxu1  ;;  %v1802_v33 = vadd.f32 %v5044_v3, %v5062_v25  ;;  %v3105_v53 = vor.u32 %v4031_v42, %v3102_v43  ;;  %v4219_v3 = vld [vmem:[#allocation4 + $0x5ec] sm:$0xf]  ;;  %v3854_v1 = vld [vmem:[#allocation4 + $0x5f8] sm:$0xf0] }
 0x18f   : > { %v4187_v43 = vld [vmem:[#allocation4 + $0x4ec] sm:$0xf] }
 0x190   : > { %v5084_v4 = vadd.f32 %v1908_v59, %v1881_v61  ;;  %v1855_v8 = vadd.f32 %v1854_v60, %v1827_v7  ;;  %2181 = vmatpush.bf16.msrb.mxu1 %v3105_v53  ;;  %v4155_v7 = vld [vmem:[#allocation4 + $0x3ec] sm:$0xf]  ;;  %v3857_v60 = vor.u32 %v4219_v3, %v3854_v1  ;;  %2349 = vmatpush.bf16.msra.mxu3 %v3873_v13  ;;  %v3710_v13 = vld [vmem:[#allocation4 + $0x4d8] sm:$0xf0] }
 0x191   : > { %v3601_v46 = vor.u32 %v4155_v7, %v3598_v45  ;;  %v3582_v45 = vld [vmem:[#allocation4 + $0x3d8] sm:$0xf0] }
 0x192   : > { %2314 = vmatpush.bf16.msra.mxu2 %v3857_v60 }
 0x193   : > { %2258 = vmatpush.bf16.msra.mxu0 %v3601_v46  ;;  %v4183_v46 = vld [vmem:[#allocation4 + $0x4cc] sm:$0xf] }
 0x195   : > { %v1882_v34 = vpop.f32.mrf.mxu2  ;;  %v1829_v50 = vpop.f32.mrf.mxu0 }
 0x196   : > { %v1883_v27 = vadd.f32 %v1882_v34, %v1855_v8  ;;  %v1910_v6 = vpop.f32.mrf.mxu3  ;;  %v1830_v37 = vadd.f32 %v1829_v50, %v1802_v33  ;;  %v1857_v14 = vpop.f32.mrf.mxu1  ;;  %v1804_v8 = vadd.f32 %v5047_v48, %v5062_v25  ;;  %v1807_v48 = vadd.f32 %v5059_v22, %v5062_v25  ;;  %v4211_v25 = vld [vmem:[#allocation4 + $0x5ac] sm:$0xf] }
 0x197   : > { %v3713_v22 = vor.u32 %v4183_v46, %v3710_v13 }
 0x198   : > { %v5088_v61 = vadd.f32 %v1910_v6, %v1883_v27  ;;  %v1858_v59 = vadd.f32 %v1857_v14, %v1830_v37  ;;  %2052 = vmatmul.bf16.gmra.mxu0 %v4881_v17  ;;  %v3726_v27 = vld [vmem:[#allocation4 + $0x4f8] sm:$0xf0]  ;;  %v4215_v37 = vld [vmem:[#allocation4 + $0x5cc] sm:$0xf] }
 0x199   : > { %2080 = vmatmul.bf16.gmra.mxu1 %v4883_v18  ;;  %v3729_v50 = vor.u32 %v4187_v43, %v3726_v27  ;;  %v3838_v14 = vld [vmem:[#allocation4 + $0x5d8] sm:$0xf0] }
 0x19a   : > { %2108 = vmatmul.bf16.gmra.mxu2 %v4945_v62  ;;  %v3841_v60 = vor.u32 %v4215_v37, %v3838_v14  ;;  %v4179_v14 = vld [vmem:[#allocation4 + $0x4ac] sm:$0xf] }
 0x19b   : > { %2136 = vmatmul.bf16.gmra.mxu3 %v4947_v63  ;;  %2286 = vmatpush.bf16.msra.mxu1 %v3729_v50 }
 0x19c   : > { %2315 = vmatpush.bf16.msra.mxu2 %v3841_v60  ;;  %v4143_v60 = vld [vmem:[#allocation4 + $0x38c] sm:$0xf] }
 0x19d   : > { %v1885_v9 = vpop.f32.mrf.mxu2  ;;  %v1831_v28 = vpop.f32.mrf.mxu0 }
 0x19e   : > { %v1886_v26 = vadd.f32 %v1885_v9, %v1858_v59  ;;  %v1913_v23 = vpop.f32.mrf.mxu3  ;;  %v1832_v33 = vadd.f32 %v1831_v28, %v1804_v8  ;;  %v1859_v34 = vpop.f32.mrf.mxu1  ;;  %v4151_v59 = vld [vmem:[#allocation4 + $0x3cc] sm:$0xf] }
 0x19f   : > { %v3585_v8 = vor.u32 %v4151_v59, %v3582_v45  ;;  %v4147_v28 = vld [vmem:[#allocation4 + $0x3ac] sm:$0xf]  ;;  %2287 = vmatpush.bf16.msra.mxu1 %v3713_v22  ;;  %v3694_v59 = vld [vmem:[#allocation4 + $0x4b8] sm:$0xf0] }
 0x1a0   : > { %v5096_v42 = vadd.f32 %v1913_v23, %v1886_v26  ;;  %v1860_v6 = vadd.f32 %v1859_v34, %v1832_v33  ;;  %v3822_v23 = vld [vmem:[#allocation4 + $0x5b8] sm:$0xf0] }
 0x1a1   : > { %2259 = vmatpush.bf16.msra.mxu0 %v3585_v8  ;;  %v3825_v33 = vor.u32 %v4211_v25, %v3822_v23  ;;  %v3566_v34 = vld [vmem:[#allocation4 + $0x3b8] sm:$0xf0]  ;;  %v4175_v25 = vld [vmem:[#allocation4 + $0x48c] sm:$0xf] }
 0x1a2   : > { %v3569_v27 = vor.u32 %v4147_v28, %v3566_v34  ;;  %v3678_v23 = vld [vmem:[#allocation4 + $0x498] sm:$0xf0]  ;;  %v5113_v34 = vld [vmem:[#allocation6] sm:$0xf] }
 0x1a3   : > { %2316 = vmatpush.bf16.msra.mxu2 %v3825_v33  ;;  %v3681_v33 = vor.u32 %v4175_v25, %v3678_v23  ;;  %v3518_v25 = vld [vmem:[#allocation4 + $0x358] sm:$0xf0] }
 0x1a5   : > { %v1887_v53 = vpop.f32.mrf.mxu2  ;;  %v1834_v7 = vpop.f32.mrf.mxu0  ;;  %2260 = vmatpush.bf16.msra.mxu0 %v3569_v27  ;;  %v3790_v27 = vld [vmem:[#allocation4 + $0x578] sm:$0xf0] }
 0x1a6   : > { %v1888_v3 = vadd.f32 %v1887_v53, %v1860_v6  ;;  %v1915_v1 = vpop.f32.mrf.mxu3  ;;  %v1835_v5 = vadd.f32 %v1834_v7, %v1807_v48  ;;  %v1862_v19 = vpop.f32.mrf.mxu1  ;;  %v3806_v7 = vld [vmem:[#allocation4 + $0x598] sm:$0xf0] }
 0x1a8   : > { %v5100_v9 = vadd.f32 %v1915_v1, %v1888_v3  ;;  %v1863_v26 = vadd.f32 %v1862_v19, %v1835_v5  ;;  %2057 = vmatmul.bf16.gmra.mxu0 %v4897_v57  ;;  %v3697_v3 = vor.u32 %v4179_v14, %v3694_v59  ;;  %v4207_v1 = vld [vmem:[#allocation4 + $0x58c] sm:$0xf]  ;;  %v3550_v5 = vld [vmem:[#allocation4 + $0x398] sm:$0xf0] }
 0x1a9   : > { %2085 = vmatmul.bf16.gmra.mxu1 %v4899_v58  ;;  %v3809_v45 = vor.u32 %v4207_v1, %v3806_v7  ;;  %v3553_v8 = vor.u32 %v4143_v60, %v3550_v5  ;;  %v3662_v60 = vld [vmem:[#allocation4 + $0x478] sm:$0xf0] }
 0x1aa   : > { %2113 = vmatmul.bf16.gmra.mxu2 %v4959_v38  ;;  %2288 = vmatpush.bf16.msra.mxu1 %v3697_v3 }
 0x1ab   : > { %2141 = vmatmul.bf16.gmra.mxu3 %v4961_v40  ;;  %2317 = vmatpush.bf16.msra.mxu2 %v3809_v45 }
 0x1ac   : > { %2261 = vmatpush.bf16.msra.mxu0 %v3553_v8 }
 0x1ad   : > { %v1890_v43 = vpop.f32.mrf.mxu2  ;;  %v1836_v48 = vpop.f32.mrf.mxu0 }
 0x1ae   : > { %v1891_v6 = vadd.f32 %v1890_v43, %v1863_v26  ;;  %v1918_v50 = vpop.f32.mrf.mxu3  ;;  %v1864_v53 = vpop.f32.mrf.mxu1  ;;  %v5116_v43 = vperm.slane %v5113_v34, 2  ;;  %2289 = vmatpush.bf16.msra.mxu1 %v3681_v33  ;;  %v3534_v48 = vld [vmem:[#allocation4 + $0x378] sm:$0xf0] }
 0x1b0   : > { %v5106_v37 = vadd.f32 %v1918_v50, %v1891_v6  ;;  %v4139_v50 = vld [vmem:[#allocation4 + $0x36c] sm:$0xf] }
 0x1b1   : > { %v3537_v14 = vor.u32 %v4139_v50, %v3534_v48 }
 0x1b3   : > { %2262 = vmatpush.bf16.msra.mxu0 %v3537_v14  ;;  %v3646_v14 = vld [vmem:[#allocation4 + $0x458] sm:$0xf0] }
 0x1b5   : > { %v1892_v19 = vpop.f32.mrf.mxu2  ;;  %v1931_v13 = vpop.f32.mrf.mxu0 }
 0x1b6   : > { %v1920_v46 = vpop.f32.mrf.mxu3  ;;  %v1932_v26 = vadd.f32 %v1931_v13, %v5072_v49  ;;  %v1959_v22 = vpop.f32.mrf.mxu1  ;;  %v4203_v49 = vld [vmem:[#allocation4 + $0x56c] sm:$0xf]  ;;  %v3774_v13 = vld [vmem:[#allocation4 + $0x558] sm:$0xf0] }
 0x1b7   : > { %v3793_v6 = vor.u32 %v4203_v49, %v3790_v27  ;;  %v4199_v46 = vld [vmem:[#allocation4 + $0x54c] sm:$0xf] }
 0x1b8   : > { %v1960_v28 = vadd.f32 %v1959_v22, %v1932_v26  ;;  %3882 = vmatmul.msk.bf16.vlgmr.msrb.gmra.mxu0 %vm1573_vm0, %v4915_v32  ;;  %v3777_v26 = vor.u32 %v4199_v46, %v3774_v13  ;;  %v4135_v22 = vld [vmem:[#allocation4 + $0x34c] sm:$0xf] }
 0x1b9   : > { %2182 = vmatmul.bf16.vlgmr.msrb.gmra.mxu1 %v4837_v47  ;;  %2318 = vmatpush.bf16.msra.mxu2 %v3793_v6 }
 0x1ba   : > { %2210 = vmatmul.bf16.vlgmr.msrb.gmra.mxu2 %v4839_v51  ;;  %v2371_v19 = vmax.f32 %v1960_v28, 0.0 }
 0x1bb   : > { %2238 = vmatmul.bf16.vlgmr.msrb.gmra.mxu3 %v4841_v52  ;;  %v4171_v52 = vld [vmem:[#allocation4 + $0x46c] sm:$0xf] }
 0x1bc   : > { %v3665_v5 = vor.u32 %v4171_v52, %v3662_v60 }
 0x1bd   : > { %v1987_v53 = vpop.f32.mrf.mxu2  ;;  %v1933_v3 = vpop.f32.mrf.mxu0  ;;  %2319 = vmatpush.bf16.msra.mxu2 %v3777_v26  ;;  %v4191_v26 = vld [vmem:[#allocation4 + $0x50c] sm:$0xf] }
 0x1be   : > { %v1988_v59 = vadd.f32 %v1987_v53, %v5116_v43  ;;  %v2015_v47 = vpop.f32.mrf.mxu3  ;;  %v1934_v51 = vadd.f32 %v1933_v3, %v5076_v24  ;;  %v1961_v1 = vpop.f32.mrf.mxu1  ;;  %2290 = vmatpush.bf16.msra.mxu1 %v3665_v5  ;;  %v3521_v24 = vor.u32 %v4135_v22, %v3518_v25  ;;  %v4167_v53 = vld [vmem:[#allocation4 + $0x44c] sm:$0xf] }
 0x1c0   : > { %v5121_v7 = vadd.f32 %v2015_v47, %v1988_v59  ;;  %v1962_v45 = vadd.f32 %v1961_v1, %v1934_v51  ;;  %2263 = vmatpush.bf16.msra.mxu0 %v3521_v24  ;;  %v3649_v47 = vor.u32 %v4167_v53, %v3646_v14  ;;  %v3758_v51 = vld [vmem:[#allocation4 + $0x538] sm:$0xf0]  ;;  %v4131_v1 = vld [vmem:[#allocation4 + $0x32c] sm:$0xf] }
 0x1c1   : > { %v4127_v24 = vld [vmem:[#allocation4 + $0x30c] sm:$0xf]  ;;  %v3614_v14 = vld [vmem:[#allocation4 + $0x418] sm:$0xf0] }
 0x1c2   : > { %v2375_v8 = vmax.f32 %v1962_v45, 0.0  ;;  %2291 = vmatpush.bf16.msra.mxu1 %v3649_v47  ;;  %v4159_v53 = vld [vmem:[#allocation4 + $0x40c] sm:$0xf] }
 0x1c4   : > { %v5123_v23 = vpack.c.bf16 %v2375_v8, %v2371_v19  ;;  %v3502_v19 = vld [vmem:[#allocation4 + $0x338] sm:$0xf0] }
 0x1c5   : > { %v1989_v33 = vpop.f32.mrf.mxu2  ;;  %v1936_v6 = vpop.f32.mrf.mxu0  ;;  %v3505_v13 = vor.u32 %v4131_v1, %v3502_v19  ;;  %v3617_v1 = vor.u32 %v4159_v53, %v3614_v14 }
 0x1c6   : > { %v1990_v49 = vadd.f32 %v1989_v33, %v5116_v43  ;;  %v2017_v27 = vpop.f32.mrf.mxu3  ;;  %v1937_v50 = vadd.f32 %v1936_v6, %v5084_v4  ;;  %v1964_v48 = vpop.f32.mrf.mxu1  ;;  %v4195_v4 = vld [vmem:[#allocation4 + $0x52c] sm:$0xf]  ;;  %v3742_v33 = vld [vmem:[#allocation4 + $0x518] sm:$0xf0] }
 0x1c7   : > { %v3761_v5 = vor.u32 %v4195_v4, %v3758_v51  ;;  %2264 = vmatpush.bf16.msra.mxu0 %v3505_v13 }
 0x1c8   : > { %v5127_v28 = vadd.f32 %v2017_v27, %v1990_v49  ;;  %v1965_v59 = vadd.f32 %v1964_v48, %v1937_v50  ;;  %3883 = vmatmul.msk.bf16.gmra.mxu0 %vm1573_vm0, %v4932_v12  ;;  %v3486_v49 = vld [vmem:[#allocation4 + $0x318] sm:$0xf0]  ;;  %v3745_v27 = vor.u32 %v4191_v26, %v3742_v33 }
 0x1c9   : > { %2187 = vmatmul.bf16.gmra.mxu1 %v4857_v31  ;;  %2320 = vmatpush.bf16.msra.mxu2 %v3761_v5  ;;  %v3489_v6 = vor.u32 %v4127_v24, %v3486_v49 }
 0x1ca   : > { %2215 = vmatmul.bf16.gmra.mxu2 %v4859_v35  ;;  %v4163_v35 = vld [vmem:[#allocation4 + $0x42c] sm:$0xf]  ;;  %v2379_v50 = vmax.f32 %v1965_v59, 0.0 }
 0x1cb   : > { %2243 = vmatmul.bf16.gmra.mxu3 %v4861_v36  ;;  %v3630_v36 = vld [vmem:[#allocation4 + $0x438] sm:$0xf0]  ;;  %2265 = vmatpush.bf16.msra.mxu0 %v3489_v6 }
 0x1cc   : > { %v3633_v25 = vor.u32 %v4163_v35, %v3630_v36 }
 0x1cd   : > { %v1992_v3 = vpop.f32.mrf.mxu2  ;;  %v1938_v45 = vpop.f32.mrf.mxu0  ;;  %2321 = vmatpush.bf16.msra.mxu2 %v3745_v27 }
 0x1ce   : > { %v1993_v52 = vadd.f32 %v1992_v3, %v5116_v43  ;;  %v2020_v60 = vpop.f32.mrf.mxu3  ;;  %v1939_v8 = vadd.f32 %v1938_v45, %v5088_v61  ;;  %v1966_v46 = vpop.f32.mrf.mxu1  ;;  %2292 = vmatpush.bf16.msra.mxu1 %v3633_v25 }
 0x1d0   : > { %v5136_v31 = vadd.f32 %v2020_v60, %v1993_v52  ;;  %v1967_v22 = vadd.f32 %v1966_v46, %v1939_v8 }
 0x1d2   : > { %v2383_v48 = vmax.f32 %v1967_v22, 0.0  ;;  %2293 = vmatpush.bf16.msra.mxu1 %v3617_v1 }
 0x1d4   : > { %v5138_v47 = vpack.c.bf16 %v2383_v48, %v2379_v50 }
 0x1d5   : > { %v1994_v61 = vpop.f32.mrf.mxu2  ;;  %v1941_v51 = vpop.f32.mrf.mxu0 }
 0x1d6   : > { %v1995_v3 = vadd.f32 %v1994_v61, %v5116_v43  ;;  %v2022_v4 = vpop.f32.mrf.mxu3  ;;  %v1942_v52 = vadd.f32 %v1941_v51, %v5096_v42  ;;  %v1969_v60 = vpop.f32.mrf.mxu1 }
 0x1d8   : > { %v5142_v45 = vadd.f32 %v2022_v4, %v1995_v3  ;;  %v1970_v59 = vadd.f32 %v1969_v60, %v1942_v52  ;;  %3884 = vmatmul.msk.bf16.gmra.mxu0 %vm1573_vm0, %v4949_v0  ;;  %v4232_v60 = vld [vmem:[#allocation7 + $0x30] sm:$0xff] }
 0x1d9   : > { %2192 = vmatmul.bf16.gmra.mxu1 %v4877_v15 }
 0x1da   : > { %2220 = vmatmul.bf16.gmra.mxu2 %v4879_v16  ;;  %v2387_v26 = vmax.f32 %v1970_v59, 0.0  ;;  %v4240_v59 = vld [vmem:[#allocation7 + $0x70] sm:$0xff] }
 0x1db   : > { %2248 = vmatmul.bf16.gmra.mxu3 %v4881_v17 }
 0x1dd   : > { %v1997_v5 = vpop.f32.mrf.mxu2  ;;  %v1943_v46 = vpop.f32.mrf.mxu0 }
 0x1de   : > { %v1998_v19 = vadd.f32 %v1997_v5, %v5116_v43  ;;  %v2025_v8 = vpop.f32.mrf.mxu3  ;;  %v1944_v42 = vadd.f32 %v1943_v46, %v5100_v9  ;;  %v1971_v13 = vpop.f32.mrf.mxu1  ;;  %v4238_v46 = vld [vmem:[#allocation7 + $0x60] sm:$0xff] }
 0x1e0   : > { %v5151_v35 = vadd.f32 %v2025_v8, %v1998_v19  ;;  %v1972_v36 = vadd.f32 %v1971_v13, %v1944_v42  ;;  %v4230_v8 = vld [vmem:[#allocation7 + $0x20] sm:$0xff]  ;;  %v4249_v42 = vld [vmem:[#allocation7 + $0xb8] sm:$0xff] }
 0x1e1   : > { %2730 = vmatpush.bf16.msrb.mxu2 %v4249_v42 }
 0x1e2   : > { %v2391_v22 = vmax.f32 %v1972_v36, 0.0 }
 0x1e4   : > { %v5153_v33 = vpack.c.bf16 %v2391_v22, %v2387_v26  ;;  %v4229_v22 = vld [vmem:[#allocation7 + $0x18] sm:$0xff] }
 0x1e5   : > { %v1999_v25 = vpop.f32.mrf.mxu2  ;;  %v1946_v17 = vpop.f32.mrf.mxu0 }
 0x1e6   : > { %v2000_v15 = vadd.f32 %v1999_v25, %v5116_v43  ;;  %v2027_v16 = vpop.f32.mrf.mxu3  ;;  %v1947_v24 = vadd.f32 %v1946_v17, %v5106_v37  ;;  %v1974_v49 = vpop.f32.mrf.mxu1  ;;  %v4237_v25 = vld [vmem:[#allocation7 + $0x58] sm:$0xff] }
 0x1e8   : > { %v5157_v27 = vadd.f32 %v2027_v16, %v2000_v15  ;;  %v5159_v6 = vadd.f32 %v1974_v49, %v1947_v24  ;;  %3885 = vmatmul.msk.bf16.gmra.mxu0 %vm1573_vm0, %v4963_v41  ;;  %v4248_v15 = vld [vmem:[#allocation7 + $0xb0] sm:$0xff] }
 0x1e9   : > { %2197 = vmatmul.bf16.gmra.mxu1 %v4893_v54  ;;  %v4233_v54 = vld [vmem:[#allocation7 + $0x38] sm:$0xff]  ;;  %2731 = vmatpush.bf16.msrb.mxu2 %v4248_v15  ;;  %v4236_v24 = vld [vmem:[#allocation7 + $0x50] sm:$0xff] }
 0x1ea   : > { %2225 = vmatmul.bf16.gmra.mxu2 %v4895_v56  ;;  %v4241_v56 = vld [vmem:[#allocation7 + $0x78] sm:$0xff]  ;;  %2674 = vmatpush.bf16.msrb.mxu0 %v4233_v54  ;;  %v4244_v54 = vld [vmem:[#allocation7 + $0x90] sm:$0xff] }
 0x1eb   : > { %2253 = vmatmul.bf16.gmra.mxu3 %v4897_v57  ;;  %2702 = vmatpush.bf16.msrb.mxu1 %v4241_v56 }
 0x1ed   : > { %v2002_v9 = vpop.f32.mrf.mxu2  ;;  %v1948_v61 = vpop.f32.mrf.mxu0 }
 0x1ee   : > { %v2003_v50 = vadd.f32 %v2002_v9, %v5116_v43  ;;  %v2030_v48 = vpop.f32.mrf.mxu3  ;;  %v1976_v37 = vpop.f32.mrf.mxu1  ;;  %2675 = vmatpush.bf16.msrb.mxu0 %v4232_v60  ;;  %v4235_v9 = vld [vmem:[#allocation7 + $0x48] sm:$0xff] }
 0x1ef   : > { %2703 = vmatpush.bf16.msrb.mxu1 %v4240_v59  ;;  %v4226_v37 = vld [vmem:[#allocation7] sm:$0xff]  ;;  %v4243_v59 = vld [vmem:[#allocation7 + $0x88] sm:$0xff] }
 0x1f0   : > { %v5167_v53 = vadd.f32 %v2030_v48, %v2003_v50 }
 0x1f5   : > { %v2004_v14 = vpop.f32.mrf.mxu2  ;;  %v2043_v4 = vpop.f32.mrf.mxu0 }
 0x1f6   : > { %v2032_v3 = vpop.f32.mrf.mxu3  ;;  %v2044_v51 = vadd.f32 %v2043_v4, %v5121_v7  ;;  %v2071_v1 = vpop.f32.mrf.mxu1  ;;  %v4234_v14 = vld [vmem:[#allocation7 + $0x40] sm:$0xff] }
 0x1f7   : > { %v4245_v3 = vld [vmem:[#allocation7 + $0x98] sm:$0xff] }
 0x1f8   : > { %v5170_v52 = vadd.f32 %v2071_v1, %v2044_v51  ;;  %2266 = vmatmul.bf16.vlgmr.msra.gmra.mxu0 %v4843_v55 }
 0x1f9   : > { %2294 = vmatmul.bf16.vlgmr.msra.gmra.mxu1 %v4911_v29  ;;  %v4231_v29 = vld [vmem:[#allocation7 + $0x28] sm:$0xff] }
 0x1fa   : > { %2322 = vmatmul.bf16.vlgmr.msra.gmra.mxu2 %v4913_v30  ;;  %v4239_v30 = vld [vmem:[#allocation7 + $0x68] sm:$0xff]  ;;  %2676 = vmatpush.bf16.msrb.mxu0 %v4231_v29 }
 0x1fb   : > { %3886 = vmatmul.msk.bf16.vlgmr.msra.gmra.mxu3 %vm1573_vm0, %v4915_v32  ;;  %2704 = vmatpush.bf16.msrb.mxu1 %v4239_v30 }
 0x1fd   : > { %v5177_v57 = vpop.f32.mrf.mxu2  ;;  %v5181_v7 = vpop.f32.mrf.mxu0 }
 0x1fe   : > { %v5179_v43 = vpop.f32.mrf.mxu3  ;;  %v5183_v55 = vpop.f32.mrf.mxu1  ;;  %2677 = vmatpush.bf16.msrb.mxu0 %v4230_v8 }
 0x1ff   : > { %2705 = vmatpush.bf16.msrb.mxu1 %v4238_v46 }
 0x202   : > { %2678 = vmatpush.bf16.msrb.mxu0 %v4229_v22  ;;  %v4257_v22 = vld [vmem:[#allocation7 + $0xf8] sm:$0xff] }
 0x203   : > { %2706 = vmatpush.bf16.msrb.mxu1 %v4237_v25  ;;  %2758 = vmatpush.bf16.msrb.mxu3 %v4257_v22 }
 0x205   : > { %v5185_v5 = vpop.f32.mrf.mxu2  ;;  %v2048_v19 = vpop.f32.mrf.mxu0 }
 0x206   : > { %v5187_v32 = vpop.f32.mrf.mxu3  ;;  %v2049_v13 = vadd.f32 %v2048_v19, %v5136_v31  ;;  %v2076_v36 = vpop.f32.mrf.mxu1 }
 0x207   : > { %2707 = vmatpush.bf16.msrb.mxu1 %v4236_v24  ;;  %v4256_v24 = vld [vmem:[#allocation7 + $0xf0] sm:$0xff] }
 0x208   : > { %v5190_v26 = vadd.f32 %v2076_v36, %v2049_v13  ;;  %2271 = vmatmul.bf16.gmra.mxu0 %v4863_v39  ;;  %v4228_v39 = vld [vmem:[#allocation7 + $0x10] sm:$0xff]  ;;  %2759 = vmatpush.bf16.msrb.mxu3 %v4256_v24 }
 0x209   : > { %2299 = vmatmul.bf16.gmra.mxu1 %v4928_v10  ;;  %v4247_v10 = vld [vmem:[#allocation7 + $0xa8] sm:$0xff]  ;;  %2679 = vmatpush.bf16.msrb.mxu0 %v4228_v39 }
 0x20a   : > { %2327 = vmatmul.bf16.gmra.mxu2 %v4930_v11  ;;  %v4227_v11 = vld [vmem:[#allocation7 + $0x8] sm:$0xff] }
 0x20b   : > { %3887 = vmatmul.msk.bf16.gmra.mxu3 %vm1573_vm0, %v4932_v12  ;;  %2732 = vmatpush.bf16.msrb.mxu2 %v4247_v10  ;;  %v4246_v12 = vld [vmem:[#allocation7 + $0xa0] sm:$0xff] }
 0x20c   : > { %2708 = vmatpush.bf16.msrb.mxu1 %v4235_v9 }
 0x20d   : > { %v5197_v31 = vpop.f32.mrf.mxu2  ;;  %v5201_v17 = vpop.f32.mrf.mxu0  ;;  %2680 = vmatpush.bf16.msrb.mxu0 %v4227_v11 }
 0x20e   : > { %v5199_v16 = vpop.f32.mrf.mxu3  ;;  %v5203_v49 = vpop.f32.mrf.mxu1 }
 0x20f   : > { %2733 = vmatpush.bf16.msrb.mxu2 %v4246_v12 }
 0x210   : > { %2709 = vmatpush.bf16.msrb.mxu1 %v4234_v14 }
 0x211   : > { %2681 = vmatpush.bf16.msrb.mxu0 %v4226_v37 }
 0x213   : > { %2734 = vmatpush.bf16.msrb.mxu2 %v4245_v3 }
 0x215   : > { %v5205_v50 = vpop.f32.mrf.mxu2  ;;  %v2053_v61 = vpop.f32.mrf.mxu0 }
 0x216   : > { %v5207_v48 = vpop.f32.mrf.mxu3  ;;  %v2054_v4 = vadd.f32 %v2053_v61, %v5151_v35  ;;  %v2081_v51 = vpop.f32.mrf.mxu1 }
 0x217   : > { %2735 = vmatpush.bf16.msrb.mxu2 %v4244_v54 }
 0x218   : > { %v5210_v1 = vadd.f32 %v2081_v51, %v2054_v4  ;;  %2276 = vmatmul.bf16.gmra.mxu0 %v4883_v18  ;;  %v4242_v18 = vld [vmem:[#allocation7 + $0x80] sm:$0xff]  ;;  %v2105_v51 = vadd.f32 %v5197_v31, %v5190_v26 }
 0x219   : > { %2304 = vmatmul.bf16.gmra.mxu1 %v4945_v62 }
 0x21a   : > { %2332 = vmatmul.bf16.gmra.mxu2 %v4947_v63 }
 0x21b   : > { %3888 = vmatmul.msk.bf16.gmra.mxu3 %vm1573_vm0, %v4949_v0  ;;  %2736 = vmatpush.bf16.msrb.mxu2 %v4243_v59 }
 0x21d   : > { %v5217_v56 = vpop.f32.mrf.mxu2  ;;  %v5221_v60 = vpop.f32.mrf.mxu0 }
 0x21e   : > { %v5219_v35 = vpop.f32.mrf.mxu3  ;;  %v5223_v29 = vpop.f32.mrf.mxu1 }
 0x21f   : > { %2737 = vmatpush.bf16.msrb.mxu2 %v4242_v18  ;;  %v4254_v18 = vld [vmem:[#allocation7 + $0xe0] sm:$0xff] }
 0x225   : > { %v5225_v30 = vpop.f32.mrf.mxu2  ;;  %v2058_v63 = vpop.f32.mrf.mxu0 }
 0x226   : > { %v5227_v62 = vpop.f32.mrf.mxu3  ;;  %v2059_v0 = vadd.f32 %v2058_v63, %v5167_v53  ;;  %v2086_v19 = vpop.f32.mrf.mxu1  ;;  %v2046_v53 = vadd.f32 %v5181_v7, %v5127_v28 }
 0x228   : > { %v5230_v8 = vadd.f32 %v2086_v19, %v2059_v0  ;;  %2281 = vmatmul.bf16.gmra.mxu0 %v4899_v58 }
 0x229   : > { %2309 = vmatmul.bf16.gmra.mxu1 %v4959_v38  ;;  %v5244_v38 = vperm.slane %v5113_v34, 3 }
 0x22a   : > { %2337 = vmatmul.bf16.gmra.mxu2 %v4961_v40  ;;  %v2100_v40 = vadd.f32 %v5177_v57, %v5170_v52 }
 0x22b   : > { %3889 = vmatmul.msk.bf16.gmra.mxu3 %vm1573_vm0, %v4963_v41  ;;  %v2074_v41 = vadd.f32 %v5183_v55, %v2046_v53 }
 0x22c   : > { %v2128_v28 = vadd.f32 %v5179_v43, %v2100_v40  ;;  %v4252_v40 = vld [vmem:[#allocation7 + $0xd0] sm:$0xff] }
 0x22d   : > { %v5237_v46 = vpop.f32.mrf.mxu2  ;;  %v2060_v13 = vpop.f32.mrf.mxu0  ;;  %v2102_v10 = vadd.f32 %v5185_v5, %v2074_v41  ;;  %v2110_v41 = vadd.f32 %v5217_v56, %v5210_v1 }
 0x22e   : > { %v5239_v42 = vpop.f32.mrf.mxu3  ;;  %v2088_v36 = vpop.f32.mrf.mxu1 }
 0x22f   : > { %v2130_v34 = vadd.f32 %v5187_v32, %v2102_v10 }
 0x235   : > { %v2116_v25 = vpop.f32.mrf.mxu2  ;;  %v2155_v15 = vpop.f32.mrf.mxu0 }
 0x236   : > { %v2144_v58 = vpop.f32.mrf.mxu3  ;;  %v2183_v39 = vpop.f32.mrf.mxu1  ;;  %v2156_v7 = vadd.f32 %v2155_v15, %v2128_v28 }
 0x237   : > { %v2184_v11 = vadd.f32 %v2183_v39, %v5244_v38 }
 0x238   : > { %2682 = vmatmul.bf16.vlgmr.msrb.gmra.mxu0 %v5025_v21  ;;  %v4255_v21 = vld [vmem:[#allocation7 + $0xe8] sm:$0xff]  ;;  %v2372_v37 = vmax.f32 %v2156_v7, 0.0 }
 0x239   : > { %2710 = vmatmul.bf16.vlgmr.msrb.gmra.mxu1 %v5123_v23  ;;  %2760 = vmatpush.bf16.msrb.mxu3 %v4255_v21  ;;  %v2051_v23 = vadd.f32 %v5201_v17, %v5142_v45  ;;  %v2133_v17 = vadd.f32 %v5199_v16, %v2105_v51 }
 0x23b   : > { %v2079_v54 = vadd.f32 %v5203_v49, %v2051_v23 }
 0x23d   : > { %v2211_v9 = vpop.f32.mrf.mxu2  ;;  %v2157_v55 = vpop.f32.mrf.mxu0  ;;  %v2107_v63 = vadd.f32 %v5205_v50, %v2079_v54  ;;  %2761 = vmatpush.bf16.msrb.mxu3 %v4254_v18 }
 0x23e   : > { %v2212_v52 = vadd.f32 %v2211_v9, %v2184_v11  ;;  %v2239_v57 = vpop.f32.mrf.mxu3  ;;  %v2158_v12 = vadd.f32 %v2157_v55, %v2130_v34  ;;  %v5255_v61 = vpop.f32.mrf.mxu1  ;;  %v2394_v55 = vmax.f32 %v5057_v20, 0.0 }
 0x23f   : > { %v2135_v0 = vadd.f32 %v5207_v48, %v2107_v63 }
 0x240   : > { %v5257_v5 = vadd.f32 %v2239_v57, %v2212_v52  ;;  %v2376_v14 = vmax.f32 %v2158_v12, 0.0  ;;  %v4251_v57 = vld [vmem:[#allocation7 + $0xc8] sm:$0xff] }
 0x242   : > { %v2400_v43 = vpack.c.bf16 %v2376_v14, %v2372_v37  ;;  %v2410_v14 = vpack.c.bf16 %v2394_v55, %v2394_v55 }
 0x244   : > { %2738 = vmatmul.bf16.vlgmr.msrb.gmra.mxu2 %v2400_v43 }
 0x245   : > { %v5261_v3 = vpop.f32.mrf.mxu2  ;;  %v2160_v4 = vpop.f32.mrf.mxu0 }
 0x246   : > { %v5263_v32 = vpop.f32.mrf.mxu3  ;;  %v2188_v59 = vpop.f32.mrf.mxu1  ;;  %v2161_v19 = vadd.f32 %v2160_v4, %v2133_v17 }
 0x247   : > { %v2189_v45 = vadd.f32 %v2188_v59, %v5244_v38 }
 0x248   : > { %2687 = vmatmul.bf16.gmra.mxu0 %v5041_v44  ;;  %v4253_v44 = vld [vmem:[#allocation7 + $0xd8] sm:$0xff]  ;;  %v2380_v53 = vmax.f32 %v2161_v19, 0.0 }
 0x249   : > { %2715 = vmatmul.bf16.gmra.mxu1 %v5138_v47  ;;  %2762 = vmatpush.bf16.msrb.mxu3 %v4253_v44  ;;  %v2056_v47 = vadd.f32 %v5221_v60, %v5157_v27  ;;  %v2138_v60 = vadd.f32 %v5219_v35, %v2110_v41  ;;  %v2395_v35 = vmax.f32 %v5159_v6, 0.0  ;;  %v4250_v6 = vld [vmem:[#allocation7 + $0xc0] sm:$0xff] }
 0x24b   : > { %v2084_v39 = vadd.f32 %v5223_v29, %v2056_v47  ;;  %v2411_v43 = vpack.c.bf16 %v2395_v35, %v2395_v35 }
 0x24d   : > { %v2216_v13 = vpop.f32.mrf.mxu2  ;;  %v2162_v49 = vpop.f32.mrf.mxu0  ;;  %2763 = vmatpush.bf16.msrb.mxu3 %v4252_v40  ;;  %v2112_v10 = vadd.f32 %v5225_v30, %v2084_v39 }
 0x24e   : > { %v2217_v26 = vadd.f32 %v2216_v13, %v2189_v45  ;;  %v2244_v31 = vpop.f32.mrf.mxu3  ;;  %v2163_v36 = vadd.f32 %v2162_v49, %v2135_v0  ;;  %v5274_v22 = vpop.f32.mrf.mxu1 }
 0x24f   : > { %v2140_v11 = vadd.f32 %v5227_v62, %v2112_v10  ;;  %v2115_v62 = vadd.f32 %v5237_v46, %v5230_v8 }
 0x250   : > { %v5276_v50 = vadd.f32 %v2244_v31, %v2217_v26  ;;  %v2384_v25 = vmax.f32 %v2163_v36, 0.0  ;;  %v2186_v26 = vadd.f32 %v5255_v61, %v5244_v38 }
 0x251   : > { %2764 = vmatpush.bf16.msrb.mxu3 %v4251_v57  ;;  %v2143_v4 = vadd.f32 %v5239_v42, %v2115_v62 }
 0x252   : > { %v2404_v16 = vpack.c.bf16 %v2384_v25, %v2380_v53  ;;  %v2214_v31 = vadd.f32 %v5261_v3, %v2186_v26  ;;  %v2191_v3 = vadd.f32 %v5274_v22, %v5244_v38 }
 0x254   : > { %2743 = vmatmul.bf16.gmra.mxu2 %v2404_v16  ;;  %v2242_v44 = vadd.f32 %v5263_v32, %v2214_v31 }
 0x255   : > { %v5280_v58 = vpop.f32.mrf.mxu2  ;;  %v2165_v15 = vpop.f32.mrf.mxu0  ;;  %2765 = vmatpush.bf16.msrb.mxu3 %v4250_v6 }
 0x256   : > { %v5282_v48 = vpop.f32.mrf.mxu3  ;;  %v2193_v24 = vpop.f32.mrf.mxu1  ;;  %v2166_v28 = vadd.f32 %v2165_v15, %v2138_v60 }
 0x257   : > { %v2194_v27 = vadd.f32 %v2193_v24, %v5244_v38 }
 0x258   : > { %2692 = vmatmul.bf16.gmra.mxu0 %v5054_v2  ;;  %v2388_v30 = vmax.f32 %v2166_v28, 0.0 }
 0x259   : > { %2720 = vmatmul.bf16.gmra.mxu1 %v5153_v33 }
 0x25d   : > { %v2221_v34 = vpop.f32.mrf.mxu2  ;;  %v2167_v56 = vpop.f32.mrf.mxu0 }
 0x25e   : > { %v2222_v7 = vadd.f32 %v2221_v34, %v2194_v27  ;;  %v2249_v1 = vpop.f32.mrf.mxu3  ;;  %v2168_v29 = vadd.f32 %v2167_v56, %v2140_v11  ;;  %v5293_v9 = vpop.f32.mrf.mxu1  ;;  %v2219_v11 = vadd.f32 %v5280_v58, %v2191_v3 }
 0x260   : > { %v5295_v52 = vadd.f32 %v2249_v1, %v2222_v7  ;;  %v2392_v2 = vmax.f32 %v2168_v29, 0.0  ;;  %v2247_v56 = vadd.f32 %v5282_v48, %v2219_v11 }
 0x262   : > { %v2408_v33 = vpack.c.bf16 %v2392_v2, %v2388_v30 }
 0x264   : > { %2748 = vmatmul.bf16.gmra.mxu2 %v2408_v33 }
 0x265   : > { %v5301_v12 = vpop.f32.mrf.mxu2  ;;  %v2170_v37 = vpop.f32.mrf.mxu0 }
 0x266   : > { %v5303_v21 = vpop.f32.mrf.mxu3  ;;  %v2198_v23 = vpop.f32.mrf.mxu1  ;;  %v2171_v51 = vadd.f32 %v2170_v37, %v2143_v4 }
 0x267   : > { %v2199_v20 = vadd.f32 %v2198_v23, %v5244_v38 }
 0x268   : > { %2697 = vmatmul.bf16.gmra.mxu0 %v2410_v14  ;;  %v2396_v18 = vmax.f32 %v2171_v51, 0.0 }
 0x269   : > { %2725 = vmatmul.bf16.gmra.mxu1 %v2411_v43 }
 0x26a   : > { %v2412_v17 = vpack.c.bf16 %v2396_v18, %v2396_v18 }
 0x26d   : > { %v2226_v54 = vpop.f32.mrf.mxu2  ;;  %v2172_v59 = vpop.f32.mrf.mxu0 }
 0x26e   : > { %v2227_v8 = vadd.f32 %v2226_v54, %v2199_v20  ;;  %v2254_v46 = vpop.f32.mrf.mxu3  ;;  %v2200_v63 = vpop.f32.mrf.mxu1 }
 0x270   : > { %v5307_v45 = vadd.f32 %v2254_v46, %v2227_v8 }
 0x274   : > { %2753 = vmatmul.bf16.gmra.mxu2 %v2412_v17 }
 0x275   : > { %v2228_v0 = vpop.f32.mrf.mxu2  ;;  %v2267_v42 = vpop.f32.mrf.mxu0 }
 0x276   : > { %v2256_v19 = vpop.f32.mrf.mxu3  ;;  %v2295_v13 = vpop.f32.mrf.mxu1  ;;  %v2268_v49 = vadd.f32 %v2267_v42, %v5257_v5 }
 0x278   : > { %v2296_v16 = vadd.f32 %v2295_v13, %v2268_v49 }
 0x27d   : > { %v2323_v36 = vpop.f32.mrf.mxu2  ;;  %v2269_v25 = vpop.f32.mrf.mxu0 }
 0x27e   : > { %v2351_v53 = vpop.f32.mrf.mxu3  ;;  %v2297_v47 = vpop.f32.mrf.mxu1  ;;  %v2270_v15 = vadd.f32 %v2269_v25, %v2242_v44  ;;  %v2324_v40 = vadd.f32 %v2323_v36, %v2296_v16 }
 0x280   : > { %v2298_v41 = vadd.f32 %v2297_v47, %v2270_v15  ;;  %v2352_v24 = vadd.f32 %v2351_v53, %v2324_v40  ;;  %v4399_v40 = vld [vmem:[%s5405_s4] ss:$0 sm:$0xff] }
 0x282   : > { %v2373_v32 = vmax.f32 %v2352_v24, 0.0 }
 0x285   : > { %v2325_v39 = vpop.f32.mrf.mxu2  ;;  %v2272_v60 = vpop.f32.mrf.mxu0 }
 0x286   : > { %v2326_v10 = vadd.f32 %v2325_v39, %v2298_v41  ;;  %v2353_v27 = vpop.f32.mrf.mxu3  ;;  %v2300_v61 = vpop.f32.mrf.mxu1  ;;  %v2273_v7 = vadd.f32 %v2272_v60, %v5276_v50  ;;  %v2196_v50 = vadd.f32 %v5293_v9, %v5244_v38 }
 0x288   : > { %v2354_v5 = vadd.f32 %v2353_v27, %v2326_v10  ;;  %v2301_v57 = vadd.f32 %v2300_v61, %v2273_v7  ;;  %v2224_v48 = vadd.f32 %v5301_v12, %v2196_v50 }
 0x28a   : > { %v2377_v28 = vmax.f32 %v2354_v5, 0.0  ;;  %v2252_v8 = vadd.f32 %v5303_v21, %v2224_v48 }
 0x28c   : > { %v2401_v34 = vpack.c.bf16 %v2377_v28, %v2373_v32 }
 0x28d   : > { %v2328_v1 = vpop.f32.mrf.mxu2  ;;  %v2274_v30 = vpop.f32.mrf.mxu0 }
 0x28e   : > { %v2356_v29 = vpop.f32.mrf.mxu3  ;;  %2766 = vmatmul.bf16.vlgmr.msrb.gmra.mxu3 %v2401_v34  ;;  %v2302_v2 = vpop.f32.mrf.mxu1  ;;  %v2275_v55 = vadd.f32 %v2274_v30, %v2247_v56  ;;  %v2329_v33 = vadd.f32 %v2328_v1, %v2301_v57 }
 0x290   : > { %v2303_v35 = vadd.f32 %v2302_v2, %v2275_v55  ;;  %v2357_v62 = vadd.f32 %v2356_v29, %v2329_v33 }
 0x292   : > { %v2381_v4 = vmax.f32 %v2357_v62, 0.0 }
 0x295   : > { %v2330_v22 = vpop.f32.mrf.mxu2  ;;  %v2277_v14 = vpop.f32.mrf.mxu0 }
 0x296   : > { %v2331_v37 = vadd.f32 %v2330_v22, %v2303_v35  ;;  %v2358_v58 = vpop.f32.mrf.mxu3  ;;  %v2305_v23 = vpop.f32.mrf.mxu1  ;;  %v2278_v51 = vadd.f32 %v2277_v14, %v5295_v52 }
 0x298   : > { %v2359_v43 = vadd.f32 %v2358_v58, %v2331_v37  ;;  %v2306_v63 = vadd.f32 %v2305_v23, %v2278_v51 }
 0x29a   : > { %v2385_v20 = vmax.f32 %v2359_v43, 0.0 }
 0x29c   : > { %v2405_v6 = vpack.c.bf16 %v2385_v20, %v2381_v4 }
 0x29d   : > { %v2333_v54 = vpop.f32.mrf.mxu2  ;;  %v2279_v59 = vpop.f32.mrf.mxu0 }
 0x29e   : > { %v2361_v46 = vpop.f32.mrf.mxu3  ;;  %2771 = vmatmul.bf16.gmra.mxu3 %v2405_v6  ;;  %v2307_v18 = vpop.f32.mrf.mxu1  ;;  %v2280_v17 = vadd.f32 %v2279_v59, %v2252_v8  ;;  %v2334_v0 = vadd.f32 %v2333_v54, %v2306_v63 }
 0x2a0   : > { %v2308_v19 = vadd.f32 %v2307_v18, %v2280_v17  ;;  %v2362_v9 = vadd.f32 %v2361_v46, %v2334_v0 }
 0x2a2   : > { %v2389_v49 = vmax.f32 %v2362_v9, 0.0 }
 0x2a5   : > { %v2335_v38 = vpop.f32.mrf.mxu2  ;;  %v2282_v13 = vpop.f32.mrf.mxu0 }
 0x2a6   : > { %v2336_v42 = vadd.f32 %v2335_v38, %v2308_v19  ;;  %v2363_v12 = vpop.f32.mrf.mxu3  ;;  %v2310_v26 = vpop.f32.mrf.mxu1  ;;  %v2283_v36 = vadd.f32 %v2282_v13, %v5307_v45 }
 0x2a8   : > { %v2364_v31 = vadd.f32 %v2363_v12, %v2336_v42  ;;  %v2311_v53 = vadd.f32 %v2310_v26, %v2283_v36 }
 0x2aa   : > { %v2393_v52 = vmax.f32 %v2364_v31, 0.0 }
 0x2ac   : > { %v2409_v21 = vpack.c.bf16 %v2393_v52, %v2389_v49 }
 0x2ad   : > { %v2338_v44 = vpop.f32.mrf.mxu2  ;;  %v2284_v25 = vpop.f32.mrf.mxu0 }
 0x2ae   : > { %2776 = vmatmul.bf16.gmra.mxu3 %v2409_v21  ;;  %v2366_v47 = vpop.f32.mrf.mxu3  ;;  %v2312_v16 = vpop.f32.mrf.mxu1  ;;  %v2339_v15 = vadd.f32 %v2338_v44, %v2311_v53 }
 0x2b0   : > { %v2367_v41 = vadd.f32 %v2366_v47, %v2339_v15 }
 0x2b2   : > { %v2397_v61 = vmax.f32 %v2367_v41, 0.0 }
 0x2b4   : > { %v2413_v3 = vpack.c.bf16 %v2397_v61, %v2397_v61 }
 0x2b5   : > { %v2340_v39 = vpop.f32.mrf.mxu2  ;;  %v2683_v10 = vpop.f32.mrf.mxu0 }
 0x2b6   : > { %v2368_v24 = vpop.f32.mrf.mxu3  ;;  %v2684_v27 = vadd.f32 %v4399_v40, %v2683_v10  ;;  %v2711_v60 = vpop.f32.mrf.mxu1 }
 0x2b8   : > { %v2712_v45 = vadd.f32 %v2711_v60, %v2684_v27 }
 0x2bd   : > { %v2685_v5 = vpop.f32.mrf.mxu0 }
 0x2be   : > { %2781 = vmatmul.bf16.gmra.mxu3 %v2413_v3  ;;  %v2686_v11 = vadd.f32 %v4399_v40, %v2685_v5  ;;  %v2713_v32 = vpop.f32.mrf.mxu1 }
 0x2c0   : > { %v2714_v28 = vadd.f32 %v2713_v32, %v2686_v11 }
 0x2c5   : > { %v2688_v34 = vpop.f32.mrf.mxu0 }
 0x2c6   : > { %v2689_v7 = vadd.f32 %v4399_v40, %v2688_v34  ;;  %v2716_v1 = vpop.f32.mrf.mxu1 }
 0x2c7   : > { %v2739_v56 = vpop.f32.mrf.mxu2 }
 0x2c8   : > { %v2717_v29 = vadd.f32 %v2716_v1, %v2689_v7  ;;  %v2740_v30 = vadd.f32 %v2739_v56, %v2712_v45 }
 0x2cd   : > { %v2690_v2 = vpop.f32.mrf.mxu0 }
 0x2ce   : > { %v2691_v57 = vadd.f32 %v4399_v40, %v2690_v2  ;;  %v2718_v55 = vpop.f32.mrf.mxu1 }
 0x2cf   : > { %v2741_v33 = vpop.f32.mrf.mxu2 }
 0x2d0   : > { %v2719_v35 = vadd.f32 %v2718_v55, %v2691_v57  ;;  %v2742_v22 = vadd.f32 %v2741_v33, %v2714_v28 }
 0x2d5   : > { %v2693_v62 = vpop.f32.mrf.mxu0 }
 0x2d6   : > { %v2694_v37 = vadd.f32 %v4399_v40, %v2693_v62  ;;  %v2721_v58 = vpop.f32.mrf.mxu1 }
 0x2d7   : > { %v2744_v14 = vpop.f32.mrf.mxu2 }
 0x2d8   : > { %v2722_v23 = vadd.f32 %v2721_v58, %v2694_v37  ;;  %v2745_v50 = vadd.f32 %v2744_v14, %v2717_v29 }
 0x2dd   : > { %v2695_v43 = vpop.f32.mrf.mxu0 }
 0x2de   : > { %v2696_v48 = vadd.f32 %v4399_v40, %v2695_v43  ;;  %v2723_v4 = vpop.f32.mrf.mxu1 }
 0x2df   : > { %v2746_v20 = vpop.f32.mrf.mxu2 }
 0x2e0   : > { %v2724_v6 = vadd.f32 %v2723_v4, %v2696_v48  ;;  %v2747_v51 = vadd.f32 %v2746_v20, %v2719_v35 }
 0x2e5   : > { %v2698_v54 = vpop.f32.mrf.mxu0 }
 0x2e6   : > { %v2699_v8 = vadd.f32 %v4399_v40, %v2698_v54  ;;  %v2726_v46 = vpop.f32.mrf.mxu1 }
 0x2e7   : > { %v2749_v59 = vpop.f32.mrf.mxu2 }
 0x2e8   : > { %v2727_v18 = vadd.f32 %v2726_v46, %v2699_v8  ;;  %v2750_v63 = vadd.f32 %v2749_v59, %v2722_v23 }
 0x2ed   : > { %v2700_v17 = vpop.f32.mrf.mxu0 }
 0x2ee   : > { %v2728_v0 = vpop.f32.mrf.mxu1 }
 0x2ef   : > { %v2751_v19 = vpop.f32.mrf.mxu2 }
 0x2f0   : > { %v2752_v38 = vadd.f32 %v2751_v19, %v2724_v6 }
 0x2f7   : > { %v2754_v9 = vpop.f32.mrf.mxu2 }
 0x2f8   : > { %v2755_v42 = vadd.f32 %v2754_v9, %v2727_v18 }
 0x2ff   : > { %v2756_v12 = vpop.f32.mrf.mxu2 }
 0x311   : > { %v2767_v13 = vpop.f32.mrf.mxu3 }
 0x312   : > { %v2768_v26 = vadd.f32 %v2767_v13, %v2740_v30 }
 0x314   : > { %2786 = vst [vmem:[%s5329_s27] sm:$0xff] %v2768_v26 }
 0x319   : > { %v2769_v31 = vpop.f32.mrf.mxu3 }
 0x31a   : > { %v2770_v49 = vadd.f32 %v2769_v31, %v2742_v22 }
 0x31c   : > { %2787 = vst [vmem:[%s5329_s27 + $0x8] sm:$0xff] %v2770_v49 }
 0x321   : > { %v2772_v52 = vpop.f32.mrf.mxu3 }
 0x322   : > { %v2773_v36 = vadd.f32 %v2772_v52, %v2745_v50 }
 0x324   : > { %2788 = vst [vmem:[%s5329_s27 + $0x10] sm:$0xff] %v2773_v36 }
 0x329   : > { %v2774_v21 = vpop.f32.mrf.mxu3 }
 0x32a   : > { %v2775_v44 = vadd.f32 %v2774_v21, %v2747_v51 }
 0x32c   : > { %2789 = vst [vmem:[%s5329_s27 + $0x18] sm:$0xff] %v2775_v44 }
 0x331   : > { %v2777_v53 = vpop.f32.mrf.mxu3 }
 0x332   : > { %v2778_v25 = vadd.f32 %v2777_v53, %v2750_v63 }
 0x334   : > { %2790 = vst [vmem:[%s5329_s27 + $0x20] sm:$0xff] %v2778_v25 }
 0x339   : > { %v2779_v47 = vpop.f32.mrf.mxu3 }
 0x33a   : > { %v2780_v16 = vadd.f32 %v2779_v47, %v2752_v38 }
 0x33c   : > { %2791 = vst [vmem:[%s5329_s27 + $0x28] sm:$0xff] %v2780_v16 }
 0x341   : > { %v2782_v15 = vpop.f32.mrf.mxu3 }
 0x342   : > { %v2783_v40 = vadd.f32 %v2782_v15, %v2755_v42 }
 0x344   : > { %2792 = vst [vmem:[%s5329_s27 + $0x30] sm:$0xff] %v2783_v40 }
 0x345   : > { %2799 = sbr.rel (!%p4732_p10) target bundleno = 896 (0x380), region = 60 }
 0x349   : > { %v2784_v41 = vpop.f32.mrf.mxu3 }
 0x34a   : > { %s5430_s8 = smov (!%p2802_p8, %s2801_s8), 7 }
 0x34b   : > { %s4018_s13 = sshll.u32 %s5430_s8, 3 }
 0x34c   : > { %p4021_p9 = scmp.eq.s32.totalorder %s4018_s13, 0 }
 0x34d   : > { %4401 = sdivrem.u32 (!%p4021_p9), %s5430_s8, 7 }
 0x34e   : > { %2810 = sbr.rel (%p4021_p9) target bundleno = 896 (0x380), region = 64 }
 0x356   : > { %s5351_s29 = spop.drf %4401 }
 0x357   : > { %s4403_s21 = spop.drf %4401  ;;  %p4022_p10 = scmp.le.s32.totalorder %s5351_s29, 0 }
 0x358   : > { %s5418_s22 = smov (!%p4022_p10), %s5345_s12  ;;  %s5419_s15 = smov (!%p4022_p10), %s5329_s27 }
 0x359   : > { %3001 = sbr.rel (%p4022_p10) target bundleno = 870 (0x366), region = 146  ;;  %s5360_s10 = smov (!%p4022_p10), 0  }
 0x35a   : > { %s5362_s16 = smov (!%p4022_p10), 0  }
 0x35e LB: >> { %v2887_v39 = vld [vmem:[%s4618_s15] sm:$0xff]  ;;  %v2889_v24 = vld [vmem:[%s4618_s15 + $0x8] sm:$0xff]  ;;  %v2891_v10 = vld [vmem:[%s4618_s15 + $0x10] sm:$0xff]  ;;  %s2901_s14 = sadd.s32 1, %s4622_s10  ;;  %s2881_s16 = sadd.s32 1, %s4626_s16   ;;  %s4626_s16 = sphi %s5362_s16, %s2881_s16   ;;  %s4622_s10 = sphi %s5360_s10, %s5420_s10   ;;  %s4618_s15 = sphi %s5419_s15, %s2906_s15   ;;  %s4614_s22 = sphi %s5418_s22, %s2907_s22  }
 0x35f   : >> { %2888 = vst [vmem:[%s4614_s22] sm:$0xff] %v2887_v39  ;;  %v2893_v27 = vld [vmem:[%s4618_s15 + $0x18] sm:$0xff]  ;;  %p2902_p12 = scmp.ge.s32.totalorder %s2901_s14, %s5351_s29  ;;  %v2895_v60 = vld [vmem:[%s4618_s15 + $0x20] sm:$0xff]  ;;  %v2897_v61 = vld [vmem:[%s4618_s15 + $0x28] sm:$0xff]  ;;  %p2880_p13 = scmp.ge.s32.totalorder %s2881_s16, %s5351_s29 }
 0x360   : >> { %2890 = vst [vmem:[%s4614_s22 + $0x8] sm:$0xff] %v2889_v24  ;;  %v2899_v45 = vld [vmem:[%s4618_s15 + $0x30] sm:$0xff] }
 0x361   : >> { %2892 = vst [vmem:[%s4614_s22 + $0x10] sm:$0xff] %v2891_v10  ;;  %s5432_s14 = smov (%p2902_p12, %s2901_s14), 0  ;;  %2883 = sbr.rel (!%p2880_p13) target bundleno = 862 (0x35e), region = 152 }
 0x362   : >> { %2894 = vst [vmem:[%s4614_s22 + $0x18] sm:$0xff] %v2893_v27  ;;  %s2904_s17 = smul.u32 56, %s5432_s14  ;;  %s5420_s10 = smov %s5432_s14 }
 0x363   : >> { %2896 = vst [vmem:[%s4614_s22 + $0x20] sm:$0xff] %v2895_v60 }
 0x364   : >> { %2898 = vst [vmem:[%s4614_s22 + $0x28] sm:$0xff] %v2897_v61  ;;  %s2906_s15 = scalar_lea.vmem %s5329_s27, %s2904_s17 [#allocation9]  }
 0x365   : >> { %2900 = vst [vmem:[%s4614_s22 + $0x30] sm:$0xff] %v2899_v45  ;;  %s2907_s22 = scalar_lea.vmem %s5345_s12, %s2904_s17  }
 0x366 PF: > { %4404 = sdivrem.u32 %s5430_s8, 7 }
 0x367   : > { %s4023_s18 = smul.u32 56, %s5351_s29 }
 0x369   : > { %s5383_s11 = scalar_lea.vmem %s5329_s27, %s4023_s18 [#allocation9]   ;;  %s2914_s28 = scalar_lea.vmem %s5345_s12, %s4023_s18  }
 0x36f   : > { %s4405_s30 = spop.drf %4404 }
 0x370   : > { %s4406_s24 = spop.drf %4404 }
 0x371   : > { %p4025_p0 = scmp.le.s32.totalorder %s4406_s24, 0 }
 0x372   : > { %s4628_s6 = smov (!%p4025_p0), %s2914_s28   ;;  %s4632_s7 = smov (!%p4025_p0), %s5383_s11  }
 0x373   : > { %3015 = sbr.rel (%p4025_p0) target bundleno = 896 (0x380), region = 157  ;;  %s4636_s25 = smov (!%p4025_p0), 0  }
 0x374   : > { %s4640_s9 = smov (!%p4025_p0), 0  }
 0x378 LB: >> { %v2924_v3 = vld [vmem:[%s4634_s7] sm:$0xff]  ;;  %s2926_s27 = sadd.s32 1, %s4638_s25  ;;  %s2918_s9 = sadd.s32 1, %s4642_s9   ;;  %s4642_s9 = sphi %s4640_s9, %s2918_s9   ;;  %s4638_s25 = sphi %s4636_s25, %s4637_s25   ;;  %s4634_s7 = sphi %s4632_s7, %s2931_s7   ;;  %s4630_s6 = sphi %s4628_s6, %s2932_s6  }
 0x379   : >> { %2925 = vst [vmem:[%s4630_s6] sm:$0xff] %v2924_v3  ;;  %p2927_p1 = scmp.ge.s32.totalorder %s2926_s27, %s4406_s24  ;;  %p2917_p3 = scmp.ge.s32.totalorder %s2918_s9, %s4406_s24 }
 0x37b   : >> { %s5434_s27 = smov (%p2927_p1, %s2926_s27), 0  ;;  %2920 = sbr.rel (!%p2917_p3) target bundleno = 888 (0x378), region = 163 }
 0x37c   : >> { %s4026_s8 = sshll.u32 %s5434_s27, 3  ;;  %s4637_s25 = smov %s5434_s27  }
 0x37d   : >> { %s2931_s7 = scalar_lea.vmem %s5383_s11, %s4026_s8 [#allocation9]   ;;  %s2932_s6 = scalar_lea.vmem %s2914_s28, %s4026_s8  }
 0x380 PF: > { %p17_p4 = scmp.ge.s32.totalorder %s4706_s23, 4   ;;  %s5421_s18 = smov %s4602_s19 }
 0x381   : > { %s5422_s19 = smov %s4606_s20  ;;  %s5423_s20 = smov %s4716_s26 }
 0x382   : > { %s5424_s21 = smov %s4706_s23  ;;  %19 = sbr.rel (!%p17_p4) target bundleno = 5 (0x5), region = 174 }
 0x387   :  { %2948 = vsyncpa [#allocation3], 1 }
 0x388   :  { %2950 = vsyncpa [#allocation3 + $0x1], 1 }
 0x389   :  { %2951 = vsyncpa [#allocation5], 1 }
 0x38a   :  { %2952 = vsyncpa [#allocation8], 1 }

</bundles_post_ra>
